<compile_context>
chip_gen: v7x
topology: tpu7x:2x2x1
jax: 0.10.0
libtpu: 0.0.40
codegen_flags: <defaults>
</compile_context>

<pallas_src>
import functools

import jax
import jax.numpy as jnp
import numpy as np
from jax.experimental import pallas as pl
from jax.experimental.pallas import tpu as pltpu


# ----------------------------------------------------------------------------
# Fused kernel: encoder LSTM -> decoder LSTM -> Linear
# ----------------------------------------------------------------------------
def seq2seq_kernel(enc_x_ref, dec_x_ref,
                   enc_wih_ref, enc_whh_ref, enc_b_ref,
                   dec_wih_ref, dec_whh_ref, dec_b_ref,
                   fc_w_ref, fc_b_ref,
                   out_ref, h_all_ref,
                   *, B, T_enc, T_dec):
    """Everything lives in VMEM; time loops are fully unrolled (static T).

    enc_x_ref : (T_enc*B, D_std)   time-major, flattened
    dec_x_ref : (T_dec*B, D_jej)   time-major, flattened
    *_wih_ref : (D, 4H)   Wih^T, gate cols reordered [i|f|o|g], i/f/o * 0.5
    *_whh_ref : (H, 4H)   Whh^T, same reorder/scale
    *_b_ref   : (1, 4H)   b_ih + b_hh, same reorder/scale
    fc_w_ref  : (H, V_pad)  W_fc^T zero-padded to a 128-lane multiple
    fc_b_ref  : (1, V_pad)
    out_ref   : (T_dec*B, V_pad)   time-major, lane-dense logits slab
    h_all_ref : (T_dec*B, H)       VMEM scratch for decoder hidden states
    """
    H = enc_whh_ref.shape[0]

    # ---- hoisted input projections: one matmul each, bias folded in --------
    enc_gx = jnp.dot(enc_x_ref[...], enc_wih_ref[...],
                     preferred_element_type=jnp.float32) + enc_b_ref[...]
    dec_gx = jnp.dot(dec_x_ref[...], dec_wih_ref[...],
                     preferred_element_type=jnp.float32) + dec_b_ref[...]

    enc_whh = enc_whh_ref[...]
    dec_whh = dec_whh_ref[...]

    def cell(gx_t, h, c, whh):
        # gates layout [i|f|o|g]; the i/f/o columns were pre-scaled by 0.5 in
        # prepare_params(), so sigmoid(z) == 0.5*tanh(z/2)+0.5 needs only the
        # single tanh pass below (one serialized EUP op per step).
        gates = gx_t + jnp.dot(h, whh, preferred_element_type=jnp.float32)
        t = jnp.tanh(gates)                          # (B, 4H), one EUP pass
        sg = 0.5 * t[:, :3 * H] + 0.5                # i | f | o  (sigmoid)
        g = t[:, 3 * H:]                             # cell-input tanh gate
        i = sg[:, 0 * H:1 * H]
        f = sg[:, 1 * H:2 * H]
        o = sg[:, 2 * H:3 * H]
        c_new = f * c + i * g
        h_new = o * jnp.tanh(c_new)
        return h_new, c_new

    h = jnp.zeros((B, H), jnp.float32)
    c = jnp.zeros((B, H), jnp.float32)

    # ---- encoder recurrence (zero init; only final (h, c) survives) --------
    for t in range(T_enc):                 # static trip count -> unrolled
        h, c = cell(enc_gx[t * B:(t + 1) * B, :], h, c, enc_whh)

    # ---- decoder recurrence; h_t stored into VMEM scratch -------------------
    for t in range(T_dec):
        h, c = cell(dec_gx[t * B:(t + 1) * B, :], h, c, dec_whh)
        h_all_ref[t * B:(t + 1) * B, :] = h          # plain static-slice store

    # ---- deferred FC: one (T_dec*B, H) x (H, V_pad) matmul, one dense store -
    logits = jnp.dot(h_all_ref[...], fc_w_ref[...],
                     preferred_element_type=jnp.float32) + fc_b_ref[...]
    out_ref[...] = logits


# ----------------------------------------------------------------------------
# One-time weight preparation (kept out of the per-call path)
# ----------------------------------------------------------------------------
def prepare_params(params):
    H = params["enc_whh"].shape[1]

    def reorder_scale(m):
        # PyTorch gate order is [i|f|g|o] along the leading 4H axis.
        # Reorder to [i|f|o|g] and pre-scale the sigmoid gates (i,f,o) by 0.5
        # so the kernel can use sigmoid(z) = 0.5*tanh(z/2)+0.5 with a single
        # tanh over the whole gate tile.
        i, f, g, o = m[0 * H:1 * H], m[1 * H:2 * H], m[2 * H:3 * H], m[3 * H:4 * H]
        return jnp.concatenate([0.5 * i, 0.5 * f, 0.5 * o, g], axis=0)

    def prep_lstm(wih, whh, bih, bhh):
        w_in = reorder_scale(wih).T                       # (D, 4H)
        w_hh = reorder_scale(whh).T                       # (H, 4H)
        b = reorder_scale(bih + bhh)[None, :]             # (1, 4H)
        return w_in, w_hh, b

    enc_wih_t, enc_whh_t, enc_b = prep_lstm(
        params["enc_wih"], params["enc_whh"], params["enc_bih"], params["enc_bhh"])
    dec_wih_t, dec_whh_t, dec_b = prep_lstm(
        params["dec_wih"], params["dec_whh"], params["dec_bih"], params["dec_bhh"])

    # FC weight transposed and zero-padded to a lane-dense (multiple-of-128)
    # output width so the kernel's only store is an unmasked vst.
    V, Hfc = params["fc_w"].shape
    V_pad = ((V + 127) // 128) * 128
    fc_w_t = jnp.zeros((Hfc, V_pad), jnp.float32).at[:, :V].set(params["fc_w"].T)
    fc_b = jnp.zeros((1, V_pad), jnp.float32).at[0, :V].set(params["fc_b"])

    return {
        "enc_wih_t": enc_wih_t, "enc_whh_t": enc_whh_t, "enc_b": enc_b,
        "dec_wih_t": dec_wih_t, "dec_whh_t": dec_whh_t, "dec_b": dec_b,
        "fc_w_t": fc_w_t, "fc_b": fc_b,
    }


# ----------------------------------------------------------------------------
# Forward wrapper
# ----------------------------------------------------------------------------
@jax.jit
def seq2seq_forward(prep, encoder_input, decoder_input):
    """encoder_input: [B, T_enc, std_vocab], decoder_input: [B, T_dec, jej_vocab]
    -> logits [B, T_dec, jej_vocab]  (same semantics as the PyTorch module)."""
    B, T_enc, D_std = encoder_input.shape
    _, T_dec, D_jej = decoder_input.shape
    H = prep["enc_whh_t"].shape[0]
    V = D_jej                                   # fc maps hidden -> jej_vocab
    V_pad = prep["fc_w_t"].shape[1]

    # Layout plumbing only (tiny arrays): time-major, flattened inputs so the
    # kernel's per-step gx slice is a contiguous static row block.
    enc_tm = jnp.swapaxes(encoder_input, 0, 1).reshape(T_enc * B, D_std)
    dec_tm = jnp.swapaxes(decoder_input, 0, 1).reshape(T_dec * B, D_jej)

    vmem = functools.partial(pl.BlockSpec, memory_space=pltpu.MemorySpace.VMEM)
    out = pl.pallas_call(
        functools.partial(seq2seq_kernel, B=B, T_enc=T_enc, T_dec=T_dec),
        out_shape=jax.ShapeDtypeStruct((T_dec * B, V_pad), jnp.float32),
        in_specs=[vmem()] * 10,
        out_specs=vmem(),
        scratch_shapes=[pltpu.VMEM((T_dec * B, H), jnp.float32)],
    )(enc_tm, dec_tm,
      prep["enc_wih_t"], prep["enc_whh_t"], prep["enc_b"],
      prep["dec_wih_t"], prep["dec_whh_t"], prep["dec_b"],
      prep["fc_w_t"], prep["fc_b"])

    # Un-pad and return batch-first, matching PyTorch batch_first=True.
    return jnp.swapaxes(out[:, :V].reshape(T_dec, B, V), 0, 1)


# ----------------------------------------------------------------------------
# Pure-JAX reference (PyTorch LSTM / Linear semantics)
# ----------------------------------------------------------------------------
def _lstm_ref(x_bt, wih, whh, b_ih, b_hh, h0, c0):
    def step(carry, x_t):
        h, c = carry
        gates = x_t @ wih.T + b_ih + h @ whh.T + b_hh
        i, f, g, o = jnp.split(gates, 4, axis=-1)
        i, f, o = jax.nn.sigmoid(i), jax.nn.sigmoid(f), jax.nn.sigmoid(o)
        g = jnp.tanh(g)
        c = f * c + i * g
        h = o * jnp.tanh(c)
        return (h, c), h
    (h, c), ys = jax.lax.scan(step, (h0, c0), jnp.swapaxes(x_bt, 0, 1))
    return jnp.swapaxes(ys, 0, 1), h, c


def seq2seq_ref(params, encoder_input, decoder_input):
    B = encoder_input.shape[0]
    H = params["enc_whh"].shape[1]
    zeros = jnp.zeros((B, H), jnp.float32)
    _, h, c = _lstm_ref(encoder_input, params["enc_wih"], params["enc_whh"],
                        params["enc_bih"], params["enc_bhh"], zeros, zeros)
    dec_out, _, _ = _lstm_ref(decoder_input, params["dec_wih"], params["dec_whh"],
                              params["dec_bih"], params["dec_bhh"], h, c)
    return dec_out @ params["fc_w"].T + params["fc_b"]


# ----------------------------------------------------------------------------
# Deterministic parameter init (PyTorch-style uniform(-1/sqrt(H), 1/sqrt(H)))
# ----------------------------------------------------------------------------
def init_params(key, std_vocab, jej_vocab, hidden):
    bound = 1.0 / np.sqrt(hidden)
    ks = jax.random.split(key, 10)
    u = lambda k, shape: jax.random.uniform(k, shape, jnp.float32, -bound, bound)
    return {
        "enc_wih": u(ks[0], (4 * hidden, std_vocab)),
        "enc_whh": u(ks[1], (4 * hidden, hidden)),
        "enc_bih": u(ks[2], (4 * hidden,)),
        "enc_bhh": u(ks[3], (4 * hidden,)),
        "dec_wih": u(ks[4], (4 * hidden, jej_vocab)),
        "dec_whh": u(ks[5], (4 * hidden, hidden)),
        "dec_bih": u(ks[6], (4 * hidden,)),
        "dec_bhh": u(ks[7], (4 * hidden,)),
        "fc_w":    u(ks[8], (jej_vocab, hidden)),
        "fc_b":    u(ks[9], (jej_vocab,)),
    }


if __name__ == "__main__":
    # Small shapes consistent with the module's forward:
    #   encoder_input: [B, T_enc, std_vocab], decoder_input: [B, T_dec, jej_vocab]
    B, T_ENC, T_DEC = 2, 8, 8
    STD_VOCAB, JEJ_VOCAB, HIDDEN = 16, 24, 32

    root = jax.random.PRNGKey(0)
    k_p, k_e, k_d = jax.random.split(root, 3)
    params = init_params(k_p, STD_VOCAB, JEJ_VOCAB, HIDDEN)
    encoder_input = jax.random.normal(k_e, (B, T_ENC, STD_VOCAB), jnp.float32)
    decoder_input = jax.random.normal(k_d, (B, T_DEC, JEJ_VOCAB), jnp.float32)

    prep = prepare_params(params)          # one-time weight prep

    out = seq2seq_forward(prep, encoder_input, decoder_input)
    out = jax.block_until_ready(out)

    ref = jax.block_until_ready(seq2seq_ref(params, encoder_input, decoder_input))
    assert out.shape == (B, T_DEC, JEJ_VOCAB), out.shape
    np.testing.assert_allclose(np.asarray(out), np.asarray(ref),
                               rtol=1e-4, atol=1e-4)
    print("KERNEL_OK")
</pallas_src>

<mosaic_0001>
module attributes {stable_mosaic.version = 11 : i64} {
  func.func @seq2seq_kernel(%arg0: memref<16x16xf32, #tpu.memory_space<vmem>>, %arg1: memref<16x24xf32, #tpu.memory_space<vmem>>, %arg2: memref<16x128xf32, #tpu.memory_space<vmem>>, %arg3: memref<32x128xf32, #tpu.memory_space<vmem>>, %arg4: memref<1x128xf32, #tpu.memory_space<vmem>>, %arg5: memref<24x128xf32, #tpu.memory_space<vmem>>, %arg6: memref<32x128xf32, #tpu.memory_space<vmem>>, %arg7: memref<1x128xf32, #tpu.memory_space<vmem>>, %arg8: memref<32x128xf32, #tpu.memory_space<vmem>>, %arg9: memref<1x128xf32, #tpu.memory_space<vmem>>, %arg10: memref<16x128xf32, #tpu.memory_space<vmem>>, %arg11: memref<16x32xf32, #tpu.memory_space<vmem>>) attributes {dimension_semantics = [], scalar_prefetch = 0 : i64, scratch_operands = 1 : i64, tpu.core_type = #tpu.core_type<tc>} {
    %c0 = arith.constant 0 : index
    %c0_0 = arith.constant 0 : index
    %0 = vector.load %arg0[%c0, %c0_0] : memref<16x16xf32, #tpu.memory_space<vmem>>, vector<16x16xf32>
    %c0_1 = arith.constant 0 : index
    %c0_2 = arith.constant 0 : index
    %1 = vector.load %arg2[%c0_1, %c0_2] : memref<16x128xf32, #tpu.memory_space<vmem>>, vector<16x128xf32>
    %cst = arith.constant dense<0.000000e+00> : vector<16x128xf32>
    %2 = tpu.matmul %0, %1, %cst {dimension_numbers = #tpu.dot_dimension_numbers<[1], [0], [0], [1], [0, 0, 1, 1], [], []>} : vector<16x16xf32>, vector<16x128xf32>, vector<16x128xf32> -> vector<16x128xf32>
    %c0_3 = arith.constant 0 : index
    %c0_4 = arith.constant 0 : index
    %3 = vector.load %arg4[%c0_3, %c0_4] : memref<1x128xf32, #tpu.memory_space<vmem>>, vector<1x128xf32>
    %4 = vector.broadcast %3 : vector<1x128xf32> to vector<16x128xf32>
    %5 = arith.addf %2, %4 : vector<16x128xf32>
    %c0_5 = arith.constant 0 : index
    %c0_6 = arith.constant 0 : index
    %6 = vector.load %arg1[%c0_5, %c0_6] : memref<16x24xf32, #tpu.memory_space<vmem>>, vector<16x24xf32>
    %c0_7 = arith.constant 0 : index
    %c0_8 = arith.constant 0 : index
    %7 = vector.load %arg5[%c0_7, %c0_8] : memref<24x128xf32, #tpu.memory_space<vmem>>, vector<24x128xf32>
    %cst_9 = arith.constant dense<0.000000e+00> : vector<16x128xf32>
    %8 = tpu.matmul %6, %7, %cst_9 {dimension_numbers = #tpu.dot_dimension_numbers<[1], [0], [0], [1], [0, 0, 1, 1], [], []>} : vector<16x24xf32>, vector<24x128xf32>, vector<16x128xf32> -> vector<16x128xf32>
    %c0_10 = arith.constant 0 : index
    %c0_11 = arith.constant 0 : index
    %9 = vector.load %arg7[%c0_10, %c0_11] : memref<1x128xf32, #tpu.memory_space<vmem>>, vector<1x128xf32>
    %10 = vector.broadcast %9 : vector<1x128xf32> to vector<16x128xf32>
    %11 = arith.addf %8, %10 : vector<16x128xf32>
    %c0_12 = arith.constant 0 : index
    %c0_13 = arith.constant 0 : index
    %12 = vector.load %arg3[%c0_12, %c0_13] : memref<32x128xf32, #tpu.memory_space<vmem>>, vector<32x128xf32>
    %c0_14 = arith.constant 0 : index
    %c0_15 = arith.constant 0 : index
    %13 = vector.load %arg6[%c0_14, %c0_15] : memref<32x128xf32, #tpu.memory_space<vmem>>, vector<32x128xf32>
    %cst_16 = arith.constant 0.000000e+00 : f32
    %14 = vector.broadcast %cst_16 : f32 to vector<2x32xf32>
    %cst_17 = arith.constant 0.000000e+00 : f32
    %15 = vector.broadcast %cst_17 : f32 to vector<2x32xf32>
    %16 = vector.extract_strided_slice %5 {offsets = [0, 0], sizes = [2, 128], strides = [1, 1]} : vector<16x128xf32> to vector<2x128xf32>
    %cst_18 = arith.constant dense<0.000000e+00> : vector<2x128xf32>
    %17 = tpu.matmul %14, %12, %cst_18 {dimension_numbers = #tpu.dot_dimension_numbers<[1], [0], [0], [1], [0, 0, 1, 1], [], []>} : vector<2x32xf32>, vector<32x128xf32>, vector<2x128xf32> -> vector<2x128xf32>
    %18 = arith.addf %16, %17 : vector<2x128xf32>
    %19 = math.tanh %18 : vector<2x128xf32>
    %20 = vector.extract_strided_slice %19 {offsets = [0, 0], sizes = [2, 96], strides = [1, 1]} : vector<2x128xf32> to vector<2x96xf32>
    %cst_19 = arith.constant 5.000000e-01 : f32
    %21 = vector.broadcast %cst_19 : f32 to vector<2x96xf32>
    %22 = arith.mulf %21, %20 : vector<2x96xf32>
    %cst_20 = arith.constant 5.000000e-01 : f32
    %23 = vector.broadcast %cst_20 : f32 to vector<2x96xf32>
    %24 = arith.addf %22, %23 : vector<2x96xf32>
    %25 = vector.extract_strided_slice %19 {offsets = [0, 96], sizes = [2, 32], strides = [1, 1]} : vector<2x128xf32> to vector<2x32xf32>
    %26 = vector.extract_strided_slice %24 {offsets = [0, 0], sizes = [2, 32], strides = [1, 1]} : vector<2x96xf32> to vector<2x32xf32>
    %27 = vector.extract_strided_slice %24 {offsets = [0, 32], sizes = [2, 32], strides = [1, 1]} : vector<2x96xf32> to vector<2x32xf32>
    %28 = vector.extract_strided_slice %24 {offsets = [0, 64], sizes = [2, 32], strides = [1, 1]} : vector<2x96xf32> to vector<2x32xf32>
    %29 = arith.mulf %27, %15 : vector<2x32xf32>
    %30 = arith.mulf %26, %25 : vector<2x32xf32>
    %31 = arith.addf %29, %30 : vector<2x32xf32>
    %32 = math.tanh %31 : vector<2x32xf32>
    %33 = arith.mulf %28, %32 : vector<2x32xf32>
    %34 = vector.extract_strided_slice %5 {offsets = [2, 0], sizes = [2, 128], strides = [1, 1]} : vector<16x128xf32> to vector<2x128xf32>
    %cst_21 = arith.constant dense<0.000000e+00> : vector<2x128xf32>
    %35 = tpu.matmul %33, %12, %cst_21 {dimension_numbers = #tpu.dot_dimension_numbers<[1], [0], [0], [1], [0, 0, 1, 1], [], []>} : vector<2x32xf32>, vector<32x128xf32>, vector<2x128xf32> -> vector<2x128xf32>
    %36 = arith.addf %34, %35 : vector<2x128xf32>
    %37 = math.tanh %36 : vector<2x128xf32>
    %38 = vector.extract_strided_slice %37 {offsets = [0, 0], sizes = [2, 96], strides = [1, 1]} : vector<2x128xf32> to vector<2x96xf32>
    %cst_22 = arith.constant 5.000000e-01 : f32
    %39 = vector.broadcast %cst_22 : f32 to vector<2x96xf32>
    %40 = arith.mulf %39, %38 : vector<2x96xf32>
    %cst_23 = arith.constant 5.000000e-01 : f32
    %41 = vector.broadcast %cst_23 : f32 to vector<2x96xf32>
    %42 = arith.addf %40, %41 : vector<2x96xf32>
    %43 = vector.extract_strided_slice %37 {offsets = [0, 96], sizes = [2, 32], strides = [1, 1]} : vector<2x128xf32> to vector<2x32xf32>
    %44 = vector.extract_strided_slice %42 {offsets = [0, 0], sizes = [2, 32], strides = [1, 1]} : vector<2x96xf32> to vector<2x32xf32>
    %45 = vector.extract_strided_slice %42 {offsets = [0, 32], sizes = [2, 32], strides = [1, 1]} : vector<2x96xf32> to vector<2x32xf32>
    %46 = vector.extract_strided_slice %42 {offsets = [0, 64], sizes = [2, 32], strides = [1, 1]} : vector<2x96xf32> to vector<2x32xf32>
    %47 = arith.mulf %45, %31 : vector<2x32xf32>
    %48 = arith.mulf %44, %43 : vector<2x32xf32>
    %49 = arith.addf %47, %48 : vector<2x32xf32>
    %50 = math.tanh %49 : vector<2x32xf32>
    %51 = arith.mulf %46, %50 : vector<2x32xf32>
    %52 = vector.extract_strided_slice %5 {offsets = [4, 0], sizes = [2, 128], strides = [1, 1]} : vector<16x128xf32> to vector<2x128xf32>
    %cst_24 = arith.constant dense<0.000000e+00> : vector<2x128xf32>
    %53 = tpu.matmul %51, %12, %cst_24 {dimension_numbers = #tpu.dot_dimension_numbers<[1], [0], [0], [1], [0, 0, 1, 1], [], []>} : vector<2x32xf32>, vector<32x128xf32>, vector<2x128xf32> -> vector<2x128xf32>
    %54 = arith.addf %52, %53 : vector<2x128xf32>
    %55 = math.tanh %54 : vector<2x128xf32>
    %56 = vector.extract_strided_slice %55 {offsets = [0, 0], sizes = [2, 96], strides = [1, 1]} : vector<2x128xf32> to vector<2x96xf32>
    %cst_25 = arith.constant 5.000000e-01 : f32
    %57 = vector.broadcast %cst_25 : f32 to vector<2x96xf32>
    %58 = arith.mulf %57, %56 : vector<2x96xf32>
    %cst_26 = arith.constant 5.000000e-01 : f32
    %59 = vector.broadcast %cst_26 : f32 to vector<2x96xf32>
    %60 = arith.addf %58, %59 : vector<2x96xf32>
    %61 = vector.extract_strided_slice %55 {offsets = [0, 96], sizes = [2, 32], strides = [1, 1]} : vector<2x128xf32> to vector<2x32xf32>
    %62 = vector.extract_strided_slice %60 {offsets = [0, 0], sizes = [2, 32], strides = [1, 1]} : vector<2x96xf32> to vector<2x32xf32>
    %63 = vector.extract_strided_slice %60 {offsets = [0, 32], sizes = [2, 32], strides = [1, 1]} : vector<2x96xf32> to vector<2x32xf32>
    %64 = vector.extract_strided_slice %60 {offsets = [0, 64], sizes = [2, 32], strides = [1, 1]} : vector<2x96xf32> to vector<2x32xf32>
    %65 = arith.mulf %63, %49 : vector<2x32xf32>
    %66 = arith.mulf %62, %61 : vector<2x32xf32>
    %67 = arith.addf %65, %66 : vector<2x32xf32>
    %68 = math.tanh %67 : vector<2x32xf32>
    %69 = arith.mulf %64, %68 : vector<2x32xf32>
    %70 = vector.extract_strided_slice %5 {offsets = [6, 0], sizes = [2, 128], strides = [1, 1]} : vector<16x128xf32> to vector<2x128xf32>
    %cst_27 = arith.constant dense<0.000000e+00> : vector<2x128xf32>
    %71 = tpu.matmul %69, %12, %cst_27 {dimension_numbers = #tpu.dot_dimension_numbers<[1], [0], [0], [1], [0, 0, 1, 1], [], []>} : vector<2x32xf32>, vector<32x128xf32>, vector<2x128xf32> -> vector<2x128xf32>
    %72 = arith.addf %70, %71 : vector<2x128xf32>
    %73 = math.tanh %72 : vector<2x128xf32>
    %74 = vector.extract_strided_slice %73 {offsets = [0, 0], sizes = [2, 96], strides = [1, 1]} : vector<2x128xf32> to vector<2x96xf32>
    %cst_28 = arith.constant 5.000000e-01 : f32
    %75 = vector.broadcast %cst_28 : f32 to vector<2x96xf32>
    %76 = arith.mulf %75, %74 : vector<2x96xf32>
    %cst_29 = arith.constant 5.000000e-01 : f32
    %77 = vector.broadcast %cst_29 : f32 to vector<2x96xf32>
    %78 = arith.addf %76, %77 : vector<2x96xf32>
    %79 = vector.extract_strided_slice %73 {offsets = [0, 96], sizes = [2, 32], strides = [1, 1]} : vector<2x128xf32> to vector<2x32xf32>
    %80 = vector.extract_strided_slice %78 {offsets = [0, 0], sizes = [2, 32], strides = [1, 1]} : vector<2x96xf32> to vector<2x32xf32>
    %81 = vector.extract_strided_slice %78 {offsets = [0, 32], sizes = [2, 32], strides = [1, 1]} : vector<2x96xf32> to vector<2x32xf32>
    %82 = vector.extract_strided_slice %78 {offsets = [0, 64], sizes = [2, 32], strides = [1, 1]} : vector<2x96xf32> to vector<2x32xf32>
    %83 = arith.mulf %81, %67 : vector<2x32xf32>
    %84 = arith.mulf %80, %79 : vector<2x32xf32>
    %85 = arith.addf %83, %84 : vector<2x32xf32>
    %86 = math.tanh %85 : vector<2x32xf32>
    %87 = arith.mulf %82, %86 : vector<2x32xf32>
    %88 = vector.extract_strided_slice %5 {offsets = [8, 0], sizes = [2, 128], strides = [1, 1]} : vector<16x128xf32> to vector<2x128xf32>
    %cst_30 = arith.constant dense<0.000000e+00> : vector<2x128xf32>
    %89 = tpu.matmul %87, %12, %cst_30 {dimension_numbers = #tpu.dot_dimension_numbers<[1], [0], [0], [1], [0, 0, 1, 1], [], []>} : vector<2x32xf32>, vector<32x128xf32>, vector<2x128xf32> -> vector<2x128xf32>
    %90 = arith.addf %88, %89 : vector<2x128xf32>
    %91 = math.tanh %90 : vector<2x128xf32>
    %92 = vector.extract_strided_slice %91 {offsets = [0, 0], sizes = [2, 96], strides = [1, 1]} : vector<2x128xf32> to vector<2x96xf32>
    %cst_31 = arith.constant 5.000000e-01 : f32
    %93 = vector.broadcast %cst_31 : f32 to vector<2x96xf32>
    %94 = arith.mulf %93, %92 : vector<2x96xf32>
    %cst_32 = arith.constant 5.000000e-01 : f32
    %95 = vector.broadcast %cst_32 : f32 to vector<2x96xf32>
    %96 = arith.addf %94, %95 : vector<2x96xf32>
    %97 = vector.extract_strided_slice %91 {offsets = [0, 96], sizes = [2, 32], strides = [1, 1]} : vector<2x128xf32> to vector<2x32xf32>
    %98 = vector.extract_strided_slice %96 {offsets = [0, 0], sizes = [2, 32], strides = [1, 1]} : vector<2x96xf32> to vector<2x32xf32>
    %99 = vector.extract_strided_slice %96 {offsets = [0, 32], sizes = [2, 32], strides = [1, 1]} : vector<2x96xf32> to vector<2x32xf32>
    %100 = vector.extract_strided_slice %96 {offsets = [0, 64], sizes = [2, 32], strides = [1, 1]} : vector<2x96xf32> to vector<2x32xf32>
    %101 = arith.mulf %99, %85 : vector<2x32xf32>
    %102 = arith.mulf %98, %97 : vector<2x32xf32>
    %103 = arith.addf %101, %102 : vector<2x32xf32>
    %104 = math.tanh %103 : vector<2x32xf32>
    %105 = arith.mulf %100, %104 : vector<2x32xf32>
    %106 = vector.extract_strided_slice %5 {offsets = [10, 0], sizes = [2, 128], strides = [1, 1]} : vector<16x128xf32> to vector<2x128xf32>
    %cst_33 = arith.constant dense<0.000000e+00> : vector<2x128xf32>
    %107 = tpu.matmul %105, %12, %cst_33 {dimension_numbers = #tpu.dot_dimension_numbers<[1], [0], [0], [1], [0, 0, 1, 1], [], []>} : vector<2x32xf32>, vector<32x128xf32>, vector<2x128xf32> -> vector<2x128xf32>
    %108 = arith.addf %106, %107 : vector<2x128xf32>
    %109 = math.tanh %108 : vector<2x128xf32>
    %110 = vector.extract_strided_slice %109 {offsets = [0, 0], sizes = [2, 96], strides = [1, 1]} : vector<2x128xf32> to vector<2x96xf32>
    %cst_34 = arith.constant 5.000000e-01 : f32
    %111 = vector.broadcast %cst_34 : f32 to vector<2x96xf32>
    %112 = arith.mulf %111, %110 : vector<2x96xf32>
    %cst_35 = arith.constant 5.000000e-01 : f32
    %113 = vector.broadcast %cst_35 : f32 to vector<2x96xf32>
    %114 = arith.addf %112, %113 : vector<2x96xf32>
    %115 = vector.extract_strided_slice %109 {offsets = [0, 96], sizes = [2, 32], strides = [1, 1]} : vector<2x128xf32> to vector<2x32xf32>
    %116 = vector.extract_strided_slice %114 {offsets = [0, 0], sizes = [2, 32], strides = [1, 1]} : vector<2x96xf32> to vector<2x32xf32>
    %117 = vector.extract_strided_slice %114 {offsets = [0, 32], sizes = [2, 32], strides = [1, 1]} : vector<2x96xf32> to vector<2x32xf32>
    %118 = vector.extract_strided_slice %114 {offsets = [0, 64], sizes = [2, 32], strides = [1, 1]} : vector<2x96xf32> to vector<2x32xf32>
    %119 = arith.mulf %117, %103 : vector<2x32xf32>
    %120 = arith.mulf %116, %115 : vector<2x32xf32>
    %121 = arith.addf %119, %120 : vector<2x32xf32>
    %122 = math.tanh %121 : vector<2x32xf32>
    %123 = arith.mulf %118, %122 : vector<2x32xf32>
    %124 = vector.extract_strided_slice %5 {offsets = [12, 0], sizes = [2, 128], strides = [1, 1]} : vector<16x128xf32> to vector<2x128xf32>
    %cst_36 = arith.constant dense<0.000000e+00> : vector<2x128xf32>
    %125 = tpu.matmul %123, %12, %cst_36 {dimension_numbers = #tpu.dot_dimension_numbers<[1], [0], [0], [1], [0, 0, 1, 1], [], []>} : vector<2x32xf32>, vector<32x128xf32>, vector<2x128xf32> -> vector<2x128xf32>
    %126 = arith.addf %124, %125 : vector<2x128xf32>
    %127 = math.tanh %126 : vector<2x128xf32>
    %128 = vector.extract_strided_slice %127 {offsets = [0, 0], sizes = [2, 96], strides = [1, 1]} : vector<2x128xf32> to vector<2x96xf32>
    %cst_37 = arith.constant 5.000000e-01 : f32
    %129 = vector.broadcast %cst_37 : f32 to vector<2x96xf32>
    %130 = arith.mulf %129, %128 : vector<2x96xf32>
    %cst_38 = arith.constant 5.000000e-01 : f32
    %131 = vector.broadcast %cst_38 : f32 to vector<2x96xf32>
    %132 = arith.addf %130, %131 : vector<2x96xf32>
    %133 = vector.extract_strided_slice %127 {offsets = [0, 96], sizes = [2, 32], strides = [1, 1]} : vector<2x128xf32> to vector<2x32xf32>
    %134 = vector.extract_strided_slice %132 {offsets = [0, 0], sizes = [2, 32], strides = [1, 1]} : vector<2x96xf32> to vector<2x32xf32>
    %135 = vector.extract_strided_slice %132 {offsets = [0, 32], sizes = [2, 32], strides = [1, 1]} : vector<2x96xf32> to vector<2x32xf32>
    %136 = vector.extract_strided_slice %132 {offsets = [0, 64], sizes = [2, 32], strides = [1, 1]} : vector<2x96xf32> to vector<2x32xf32>
    %137 = arith.mulf %135, %121 : vector<2x32xf32>
    %138 = arith.mulf %134, %133 : vector<2x32xf32>
    %139 = arith.addf %137, %138 : vector<2x32xf32>
    %140 = math.tanh %139 : vector<2x32xf32>
    %141 = arith.mulf %136, %140 : vector<2x32xf32>
    %142 = vector.extract_strided_slice %5 {offsets = [14, 0], sizes = [2, 128], strides = [1, 1]} : vector<16x128xf32> to vector<2x128xf32>
    %cst_39 = arith.constant dense<0.000000e+00> : vector<2x128xf32>
    %143 = tpu.matmul %141, %12, %cst_39 {dimension_numbers = #tpu.dot_dimension_numbers<[1], [0], [0], [1], [0, 0, 1, 1], [], []>} : vector<2x32xf32>, vector<32x128xf32>, vector<2x128xf32> -> vector<2x128xf32>
    %144 = arith.addf %142, %143 : vector<2x128xf32>
    %145 = math.tanh %144 : vector<2x128xf32>
    %146 = vector.extract_strided_slice %145 {offsets = [0, 0], sizes = [2, 96], strides = [1, 1]} : vector<2x128xf32> to vector<2x96xf32>
    %cst_40 = arith.constant 5.000000e-01 : f32
    %147 = vector.broadcast %cst_40 : f32 to vector<2x96xf32>
    %148 = arith.mulf %147, %146 : vector<2x96xf32>
    %cst_41 = arith.constant 5.000000e-01 : f32
    %149 = vector.broadcast %cst_41 : f32 to vector<2x96xf32>
    %150 = arith.addf %148, %149 : vector<2x96xf32>
    %151 = vector.extract_strided_slice %145 {offsets = [0, 96], sizes = [2, 32], strides = [1, 1]} : vector<2x128xf32> to vector<2x32xf32>
    %152 = vector.extract_strided_slice %150 {offsets = [0, 0], sizes = [2, 32], strides = [1, 1]} : vector<2x96xf32> to vector<2x32xf32>
    %153 = vector.extract_strided_slice %150 {offsets = [0, 32], sizes = [2, 32], strides = [1, 1]} : vector<2x96xf32> to vector<2x32xf32>
    %154 = vector.extract_strided_slice %150 {offsets = [0, 64], sizes = [2, 32], strides = [1, 1]} : vector<2x96xf32> to vector<2x32xf32>
    %155 = arith.mulf %153, %139 : vector<2x32xf32>
    %156 = arith.mulf %152, %151 : vector<2x32xf32>
    %157 = arith.addf %155, %156 : vector<2x32xf32>
    %158 = math.tanh %157 : vector<2x32xf32>
    %159 = arith.mulf %154, %158 : vector<2x32xf32>
    %160 = vector.extract_strided_slice %11 {offsets = [0, 0], sizes = [2, 128], strides = [1, 1]} : vector<16x128xf32> to vector<2x128xf32>
    %cst_42 = arith.constant dense<0.000000e+00> : vector<2x128xf32>
    %161 = tpu.matmul %159, %13, %cst_42 {dimension_numbers = #tpu.dot_dimension_numbers<[1], [0], [0], [1], [0, 0, 1, 1], [], []>} : vector<2x32xf32>, vector<32x128xf32>, vector<2x128xf32> -> vector<2x128xf32>
    %162 = arith.addf %160, %161 : vector<2x128xf32>
    %163 = math.tanh %162 : vector<2x128xf32>
    %164 = vector.extract_strided_slice %163 {offsets = [0, 0], sizes = [2, 96], strides = [1, 1]} : vector<2x128xf32> to vector<2x96xf32>
    %cst_43 = arith.constant 5.000000e-01 : f32
    %165 = vector.broadcast %cst_43 : f32 to vector<2x96xf32>
    %166 = arith.mulf %165, %164 : vector<2x96xf32>
    %cst_44 = arith.constant 5.000000e-01 : f32
    %167 = vector.broadcast %cst_44 : f32 to vector<2x96xf32>
    %168 = arith.addf %166, %167 : vector<2x96xf32>
    %169 = vector.extract_strided_slice %163 {offsets = [0, 96], sizes = [2, 32], strides = [1, 1]} : vector<2x128xf32> to vector<2x32xf32>
    %170 = vector.extract_strided_slice %168 {offsets = [0, 0], sizes = [2, 32], strides = [1, 1]} : vector<2x96xf32> to vector<2x32xf32>
    %171 = vector.extract_strided_slice %168 {offsets = [0, 32], sizes = [2, 32], strides = [1, 1]} : vector<2x96xf32> to vector<2x32xf32>
    %172 = vector.extract_strided_slice %168 {offsets = [0, 64], sizes = [2, 32], strides = [1, 1]} : vector<2x96xf32> to vector<2x32xf32>
    %173 = arith.mulf %171, %157 : vector<2x32xf32>
    %174 = arith.mulf %170, %169 : vector<2x32xf32>
    %175 = arith.addf %173, %174 : vector<2x32xf32>
    %176 = math.tanh %175 : vector<2x32xf32>
    %177 = arith.mulf %172, %176 : vector<2x32xf32>
    %c0_45 = arith.constant 0 : index
    %c0_46 = arith.constant 0 : index
    %178 = vector.load %arg11[%c0_45, %c0_46] : memref<16x32xf32, #tpu.memory_space<vmem>>, vector<2x32xf32>
    tpu.vector_store %arg11[%c0_45, %c0_46], %177 {strides = array<i32>} : memref<16x32xf32, #tpu.memory_space<vmem>>, vector<2x32xf32>,
    %179 = vector.extract_strided_slice %11 {offsets = [2, 0], sizes = [2, 128], strides = [1, 1]} : vector<16x128xf32> to vector<2x128xf32>
    %cst_47 = arith.constant dense<0.000000e+00> : vector<2x128xf32>
    %180 = tpu.matmul %177, %13, %cst_47 {dimension_numbers = #tpu.dot_dimension_numbers<[1], [0], [0], [1], [0, 0, 1, 1], [], []>} : vector<2x32xf32>, vector<32x128xf32>, vector<2x128xf32> -> vector<2x128xf32>
    %181 = arith.addf %179, %180 : vector<2x128xf32>
    %182 = math.tanh %181 : vector<2x128xf32>
    %183 = vector.extract_strided_slice %182 {offsets = [0, 0], sizes = [2, 96], strides = [1, 1]} : vector<2x128xf32> to vector<2x96xf32>
    %cst_48 = arith.constant 5.000000e-01 : f32
    %184 = vector.broadcast %cst_48 : f32 to vector<2x96xf32>
    %185 = arith.mulf %184, %183 : vector<2x96xf32>
    %cst_49 = arith.constant 5.000000e-01 : f32
    %186 = vector.broadcast %cst_49 : f32 to vector<2x96xf32>
    %187 = arith.addf %185, %186 : vector<2x96xf32>
    %188 = vector.extract_strided_slice %182 {offsets = [0, 96], sizes = [2, 32], strides = [1, 1]} : vector<2x128xf32> to vector<2x32xf32>
    %189 = vector.extract_strided_slice %187 {offsets = [0, 0], sizes = [2, 32], strides = [1, 1]} : vector<2x96xf32> to vector<2x32xf32>
    %190 = vector.extract_strided_slice %187 {offsets = [0, 32], sizes = [2, 32], strides = [1, 1]} : vector<2x96xf32> to vector<2x32xf32>
    %191 = vector.extract_strided_slice %187 {offsets = [0, 64], sizes = [2, 32], strides = [1, 1]} : vector<2x96xf32> to vector<2x32xf32>
    %192 = arith.mulf %190, %175 : vector<2x32xf32>
    %193 = arith.mulf %189, %188 : vector<2x32xf32>
    %194 = arith.addf %192, %193 : vector<2x32xf32>
    %195 = math.tanh %194 : vector<2x32xf32>
    %196 = arith.mulf %191, %195 : vector<2x32xf32>
    %c2 = arith.constant 2 : index
    %c0_50 = arith.constant 0 : index
    %197 = vector.load %arg11[%c2, %c0_50] : memref<16x32xf32, #tpu.memory_space<vmem>>, vector<2x32xf32>
    tpu.vector_store %arg11[%c2, %c0_50], %196 {strides = array<i32>} : memref<16x32xf32, #tpu.memory_space<vmem>>, vector<2x32xf32>,
    %198 = vector.extract_strided_slice %11 {offsets = [4, 0], sizes = [2, 128], strides = [1, 1]} : vector<16x128xf32> to vector<2x128xf32>
    %cst_51 = arith.constant dense<0.000000e+00> : vector<2x128xf32>
    %199 = tpu.matmul %196, %13, %cst_51 {dimension_numbers = #tpu.dot_dimension_numbers<[1], [0], [0], [1], [0, 0, 1, 1], [], []>} : vector<2x32xf32>, vector<32x128xf32>, vector<2x128xf32> -> vector<2x128xf32>
    %200 = arith.addf %198, %199 : vector<2x128xf32>
    %201 = math.tanh %200 : vector<2x128xf32>
    %202 = vector.extract_strided_slice %201 {offsets = [0, 0], sizes = [2, 96], strides = [1, 1]} : vector<2x128xf32> to vector<2x96xf32>
    %cst_52 = arith.constant 5.000000e-01 : f32
    %203 = vector.broadcast %cst_52 : f32 to vector<2x96xf32>
    %204 = arith.mulf %203, %202 : vector<2x96xf32>
    %cst_53 = arith.constant 5.000000e-01 : f32
    %205 = vector.broadcast %cst_53 : f32 to vector<2x96xf32>
    %206 = arith.addf %204, %205 : vector<2x96xf32>
    %207 = vector.extract_strided_slice %201 {offsets = [0, 96], sizes = [2, 32], strides = [1, 1]} : vector<2x128xf32> to vector<2x32xf32>
    %208 = vector.extract_strided_slice %206 {offsets = [0, 0], sizes = [2, 32], strides = [1, 1]} : vector<2x96xf32> to vector<2x32xf32>
    %209 = vector.extract_strided_slice %206 {offsets = [0, 32], sizes = [2, 32], strides = [1, 1]} : vector<2x96xf32> to vector<2x32xf32>
    %210 = vector.extract_strided_slice %206 {offsets = [0, 64], sizes = [2, 32], strides = [1, 1]} : vector<2x96xf32> to vector<2x32xf32>
    %211 = arith.mulf %209, %194 : vector<2x32xf32>
    %212 = arith.mulf %208, %207 : vector<2x32xf32>
    %213 = arith.addf %211, %212 : vector<2x32xf32>
    %214 = math.tanh %213 : vector<2x32xf32>
    %215 = arith.mulf %210, %214 : vector<2x32xf32>
    %c4 = arith.constant 4 : index
    %c0_54 = arith.constant 0 : index
    %216 = vector.load %arg11[%c4, %c0_54] : memref<16x32xf32, #tpu.memory_space<vmem>>, vector<2x32xf32>
    tpu.vector_store %arg11[%c4, %c0_54], %215 {strides = array<i32>} : memref<16x32xf32, #tpu.memory_space<vmem>>, vector<2x32xf32>,
    %217 = vector.extract_strided_slice %11 {offsets = [6, 0], sizes = [2, 128], strides = [1, 1]} : vector<16x128xf32> to vector<2x128xf32>
    %cst_55 = arith.constant dense<0.000000e+00> : vector<2x128xf32>
    %218 = tpu.matmul %215, %13, %cst_55 {dimension_numbers = #tpu.dot_dimension_numbers<[1], [0], [0], [1], [0, 0, 1, 1], [], []>} : vector<2x32xf32>, vector<32x128xf32>, vector<2x128xf32> -> vector<2x128xf32>
    %219 = arith.addf %217, %218 : vector<2x128xf32>
    %220 = math.tanh %219 : vector<2x128xf32>
    %221 = vector.extract_strided_slice %220 {offsets = [0, 0], sizes = [2, 96], strides = [1, 1]} : vector<2x128xf32> to vector<2x96xf32>
    %cst_56 = arith.constant 5.000000e-01 : f32
    %222 = vector.broadcast %cst_56 : f32 to vector<2x96xf32>
    %223 = arith.mulf %222, %221 : vector<2x96xf32>
    %cst_57 = arith.constant 5.000000e-01 : f32
    %224 = vector.broadcast %cst_57 : f32 to vector<2x96xf32>
    %225 = arith.addf %223, %224 : vector<2x96xf32>
    %226 = vector.extract_strided_slice %220 {offsets = [0, 96], sizes = [2, 32], strides = [1, 1]} : vector<2x128xf32> to vector<2x32xf32>
    %227 = vector.extract_strided_slice %225 {offsets = [0, 0], sizes = [2, 32], strides = [1, 1]} : vector<2x96xf32> to vector<2x32xf32>
    %228 = vector.extract_strided_slice %225 {offsets = [0, 32], sizes = [2, 32], strides = [1, 1]} : vector<2x96xf32> to vector<2x32xf32>
    %229 = vector.extract_strided_slice %225 {offsets = [0, 64], sizes = [2, 32], strides = [1, 1]} : vector<2x96xf32> to vector<2x32xf32>
    %230 = arith.mulf %228, %213 : vector<2x32xf32>
    %231 = arith.mulf %227, %226 : vector<2x32xf32>
    %232 = arith.addf %230, %231 : vector<2x32xf32>
    %233 = math.tanh %232 : vector<2x32xf32>
    %234 = arith.mulf %229, %233 : vector<2x32xf32>
    %c6 = arith.constant 6 : index
    %c0_58 = arith.constant 0 : index
    %235 = vector.load %arg11[%c6, %c0_58] : memref<16x32xf32, #tpu.memory_space<vmem>>, vector<2x32xf32>
    tpu.vector_store %arg11[%c6, %c0_58], %234 {strides = array<i32>} : memref<16x32xf32, #tpu.memory_space<vmem>>, vector<2x32xf32>,
    %236 = vector.extract_strided_slice %11 {offsets = [8, 0], sizes = [2, 128], strides = [1, 1]} : vector<16x128xf32> to vector<2x128xf32>
    %cst_59 = arith.constant dense<0.000000e+00> : vector<2x128xf32>
    %237 = tpu.matmul %234, %13, %cst_59 {dimension_numbers = #tpu.dot_dimension_numbers<[1], [0], [0], [1], [0, 0, 1, 1], [], []>} : vector<2x32xf32>, vector<32x128xf32>, vector<2x128xf32> -> vector<2x128xf32>
    %238 = arith.addf %236, %237 : vector<2x128xf32>
    %239 = math.tanh %238 : vector<2x128xf32>
    %240 = vector.extract_strided_slice %239 {offsets = [0, 0], sizes = [2, 96], strides = [1, 1]} : vector<2x128xf32> to vector<2x96xf32>
    %cst_60 = arith.constant 5.000000e-01 : f32
    %241 = vector.broadcast %cst_60 : f32 to vector<2x96xf32>
    %242 = arith.mulf %241, %240 : vector<2x96xf32>
    %cst_61 = arith.constant 5.000000e-01 : f32
    %243 = vector.broadcast %cst_61 : f32 to vector<2x96xf32>
    %244 = arith.addf %242, %243 : vector<2x96xf32>
    %245 = vector.extract_strided_slice %239 {offsets = [0, 96], sizes = [2, 32], strides = [1, 1]} : vector<2x128xf32> to vector<2x32xf32>
    %246 = vector.extract_strided_slice %244 {offsets = [0, 0], sizes = [2, 32], strides = [1, 1]} : vector<2x96xf32> to vector<2x32xf32>
    %247 = vector.extract_strided_slice %244 {offsets = [0, 32], sizes = [2, 32], strides = [1, 1]} : vector<2x96xf32> to vector<2x32xf32>
    %248 = vector.extract_strided_slice %244 {offsets = [0, 64], sizes = [2, 32], strides = [1, 1]} : vector<2x96xf32> to vector<2x32xf32>
    %249 = arith.mulf %247, %232 : vector<2x32xf32>
    %250 = arith.mulf %246, %245 : vector<2x32xf32>
    %251 = arith.addf %249, %250 : vector<2x32xf32>
    %252 = math.tanh %251 : vector<2x32xf32>
    %253 = arith.mulf %248, %252 : vector<2x32xf32>
    %c8 = arith.constant 8 : index
    %c0_62 = arith.constant 0 : index
    %254 = vector.load %arg11[%c8, %c0_62] : memref<16x32xf32, #tpu.memory_space<vmem>>, vector<2x32xf32>
    tpu.vector_store %arg11[%c8, %c0_62], %253 {strides = array<i32>} : memref<16x32xf32, #tpu.memory_space<vmem>>, vector<2x32xf32>,
    %255 = vector.extract_strided_slice %11 {offsets = [10, 0], sizes = [2, 128], strides = [1, 1]} : vector<16x128xf32> to vector<2x128xf32>
    %cst_63 = arith.constant dense<0.000000e+00> : vector<2x128xf32>
    %256 = tpu.matmul %253, %13, %cst_63 {dimension_numbers = #tpu.dot_dimension_numbers<[1], [0], [0], [1], [0, 0, 1, 1], [], []>} : vector<2x32xf32>, vector<32x128xf32>, vector<2x128xf32> -> vector<2x128xf32>
    %257 = arith.addf %255, %256 : vector<2x128xf32>
    %258 = math.tanh %257 : vector<2x128xf32>
    %259 = vector.extract_strided_slice %258 {offsets = [0, 0], sizes = [2, 96], strides = [1, 1]} : vector<2x128xf32> to vector<2x96xf32>
    %cst_64 = arith.constant 5.000000e-01 : f32
    %260 = vector.broadcast %cst_64 : f32 to vector<2x96xf32>
    %261 = arith.mulf %260, %259 : vector<2x96xf32>
    %cst_65 = arith.constant 5.000000e-01 : f32
    %262 = vector.broadcast %cst_65 : f32 to vector<2x96xf32>
    %263 = arith.addf %261, %262 : vector<2x96xf32>
    %264 = vector.extract_strided_slice %258 {offsets = [0, 96], sizes = [2, 32], strides = [1, 1]} : vector<2x128xf32> to vector<2x32xf32>
    %265 = vector.extract_strided_slice %263 {offsets = [0, 0], sizes = [2, 32], strides = [1, 1]} : vector<2x96xf32> to vector<2x32xf32>
    %266 = vector.extract_strided_slice %263 {offsets = [0, 32], sizes = [2, 32], strides = [1, 1]} : vector<2x96xf32> to vector<2x32xf32>
    %267 = vector.extract_strided_slice %263 {offsets = [0, 64], sizes = [2, 32], strides = [1, 1]} : vector<2x96xf32> to vector<2x32xf32>
    %268 = arith.mulf %266, %251 : vector<2x32xf32>
    %269 = arith.mulf %265, %264 : vector<2x32xf32>
    %270 = arith.addf %268, %269 : vector<2x32xf32>
    %271 = math.tanh %270 : vector<2x32xf32>
    %272 = arith.mulf %267, %271 : vector<2x32xf32>
    %c10 = arith.constant 10 : index
    %c0_66 = arith.constant 0 : index
    %273 = vector.load %arg11[%c10, %c0_66] : memref<16x32xf32, #tpu.memory_space<vmem>>, vector<2x32xf32>
    tpu.vector_store %arg11[%c10, %c0_66], %272 {strides = array<i32>} : memref<16x32xf32, #tpu.memory_space<vmem>>, vector<2x32xf32>,
    %274 = vector.extract_strided_slice %11 {offsets = [12, 0], sizes = [2, 128], strides = [1, 1]} : vector<16x128xf32> to vector<2x128xf32>
    %cst_67 = arith.constant dense<0.000000e+00> : vector<2x128xf32>
    %275 = tpu.matmul %272, %13, %cst_67 {dimension_numbers = #tpu.dot_dimension_numbers<[1], [0], [0], [1], [0, 0, 1, 1], [], []>} : vector<2x32xf32>, vector<32x128xf32>, vector<2x128xf32> -> vector<2x128xf32>
    %276 = arith.addf %274, %275 : vector<2x128xf32>
    %277 = math.tanh %276 : vector<2x128xf32>
    %278 = vector.extract_strided_slice %277 {offsets = [0, 0], sizes = [2, 96], strides = [1, 1]} : vector<2x128xf32> to vector<2x96xf32>
    %cst_68 = arith.constant 5.000000e-01 : f32
    %279 = vector.broadcast %cst_68 : f32 to vector<2x96xf32>
    %280 = arith.mulf %279, %278 : vector<2x96xf32>
    %cst_69 = arith.constant 5.000000e-01 : f32
    %281 = vector.broadcast %cst_69 : f32 to vector<2x96xf32>
    %282 = arith.addf %280, %281 : vector<2x96xf32>
    %283 = vector.extract_strided_slice %277 {offsets = [0, 96], sizes = [2, 32], strides = [1, 1]} : vector<2x128xf32> to vector<2x32xf32>
    %284 = vector.extract_strided_slice %282 {offsets = [0, 0], sizes = [2, 32], strides = [1, 1]} : vector<2x96xf32> to vector<2x32xf32>
    %285 = vector.extract_strided_slice %282 {offsets = [0, 32], sizes = [2, 32], strides = [1, 1]} : vector<2x96xf32> to vector<2x32xf32>
    %286 = vector.extract_strided_slice %282 {offsets = [0, 64], sizes = [2, 32], strides = [1, 1]} : vector<2x96xf32> to vector<2x32xf32>
    %287 = arith.mulf %285, %270 : vector<2x32xf32>
    %288 = arith.mulf %284, %283 : vector<2x32xf32>
    %289 = arith.addf %287, %288 : vector<2x32xf32>
    %290 = math.tanh %289 : vector<2x32xf32>
    %291 = arith.mulf %286, %290 : vector<2x32xf32>
    %c12 = arith.constant 12 : index
    %c0_70 = arith.constant 0 : index
    %292 = vector.load %arg11[%c12, %c0_70] : memref<16x32xf32, #tpu.memory_space<vmem>>, vector<2x32xf32>
    tpu.vector_store %arg11[%c12, %c0_70], %291 {strides = array<i32>} : memref<16x32xf32, #tpu.memory_space<vmem>>, vector<2x32xf32>,
    %293 = vector.extract_strided_slice %11 {offsets = [14, 0], sizes = [2, 128], strides = [1, 1]} : vector<16x128xf32> to vector<2x128xf32>
    %cst_71 = arith.constant dense<0.000000e+00> : vector<2x128xf32>
    %294 = tpu.matmul %291, %13, %cst_71 {dimension_numbers = #tpu.dot_dimension_numbers<[1], [0], [0], [1], [0, 0, 1, 1], [], []>} : vector<2x32xf32>, vector<32x128xf32>, vector<2x128xf32> -> vector<2x128xf32>
    %295 = arith.addf %293, %294 : vector<2x128xf32>
    %296 = math.tanh %295 : vector<2x128xf32>
    %297 = vector.extract_strided_slice %296 {offsets = [0, 0], sizes = [2, 96], strides = [1, 1]} : vector<2x128xf32> to vector<2x96xf32>
    %cst_72 = arith.constant 5.000000e-01 : f32
    %298 = vector.broadcast %cst_72 : f32 to vector<2x96xf32>
    %299 = arith.mulf %298, %297 : vector<2x96xf32>
    %cst_73 = arith.constant 5.000000e-01 : f32
    %300 = vector.broadcast %cst_73 : f32 to vector<2x96xf32>
    %301 = arith.addf %299, %300 : vector<2x96xf32>
    %302 = vector.extract_strided_slice %296 {offsets = [0, 96], sizes = [2, 32], strides = [1, 1]} : vector<2x128xf32> to vector<2x32xf32>
    %303 = vector.extract_strided_slice %301 {offsets = [0, 0], sizes = [2, 32], strides = [1, 1]} : vector<2x96xf32> to vector<2x32xf32>
    %304 = vector.extract_strided_slice %301 {offsets = [0, 32], sizes = [2, 32], strides = [1, 1]} : vector<2x96xf32> to vector<2x32xf32>
    %305 = vector.extract_strided_slice %301 {offsets = [0, 64], sizes = [2, 32], strides = [1, 1]} : vector<2x96xf32> to vector<2x32xf32>
    %306 = arith.mulf %304, %289 : vector<2x32xf32>
    %307 = arith.mulf %303, %302 : vector<2x32xf32>
    %308 = arith.addf %306, %307 : vector<2x32xf32>
    %309 = math.tanh %308 : vector<2x32xf32>
    %310 = arith.mulf %305, %309 : vector<2x32xf32>
    %c14 = arith.constant 14 : index
    %c0_74 = arith.constant 0 : index
    %311 = vector.load %arg11[%c14, %c0_74] : memref<16x32xf32, #tpu.memory_space<vmem>>, vector<2x32xf32>
    tpu.vector_store %arg11[%c14, %c0_74], %310 {strides = array<i32>} : memref<16x32xf32, #tpu.memory_space<vmem>>, vector<2x32xf32>,
    %c0_75 = arith.constant 0 : index
    %c0_76 = arith.constant 0 : index
    %312 = vector.load %arg11[%c0_75, %c0_76] : memref<16x32xf32, #tpu.memory_space<vmem>>, vector<16x32xf32>
    %c0_77 = arith.constant 0 : index
    %c0_78 = arith.constant 0 : index
    %313 = vector.load %arg8[%c0_77, %c0_78] : memref<32x128xf32, #tpu.memory_space<vmem>>, vector<32x128xf32>
    %cst_79 = arith.constant dense<0.000000e+00> : vector<16x128xf32>
    %314 = tpu.matmul %312, %313, %cst_79 {dimension_numbers = #tpu.dot_dimension_numbers<[1], [0], [0], [1], [0, 0, 1, 1], [], []>} : vector<16x32xf32>, vector<32x128xf32>, vector<16x128xf32> -> vector<16x128xf32>
    %c0_80 = arith.constant 0 : index
    %c0_81 = arith.constant 0 : index
    %315 = vector.load %arg9[%c0_80, %c0_81] : memref<1x128xf32, #tpu.memory_space<vmem>>, vector<1x128xf32>
    %316 = vector.broadcast %315 : vector<1x128xf32> to vector<16x128xf32>
    %317 = arith.addf %314, %316 : vector<16x128xf32>
    %c0_82 = arith.constant 0 : index
    %c0_83 = arith.constant 0 : index
    %318 = vector.load %arg10[%c0_82, %c0_83] : memref<16x128xf32, #tpu.memory_space<vmem>>, vector<16x128xf32>
    tpu.vector_store %arg10[%c0_82, %c0_83], %317 {strides = array<i32>} : memref<16x128xf32, #tpu.memory_space<vmem>>, vector<16x128xf32>,
    return
  }
}

</mosaic_0001>

<bundles_post_ra>
// kernel: seq2seq_forward.1
= control target key start
LH: loop header
LB: loop body
LE: loop exit
PB: predicated region body
PF: predicated region fallthrough
CT: control target
= control target key end

     0   :  { %15 = vsyncpa [#allocation4], 0  ;;  %s3069_s0 = inlined_call_operand.vmem [shape: f32[16,16], index: 0, kind: input, shape index: {}]   ;;  %s3070_s1 = inlined_call_operand.vmem [shape: f32[16,24], index: 1, kind: input, shape index: {}]   ;;  %s3071_s2 = inlined_call_operand.hbm [shape: f32[16,128], index: 2, kind: input, shape index: {}]   ;;  %s3072_s3 = inlined_call_operand.vmem [shape: f32[32,128], index: 3, kind: input, shape index: {}]   ;;  %s3073_s4 = inlined_call_operand.vmem [shape: f32[1,128], index: 4, kind: input, shape index: {}]   ;;  %s3074_s5 = inlined_call_operand.hbm [shape: f32[24,128], index: 5, kind: input, shape index: {}]   ;;  %s3075_s6 = inlined_call_operand.vmem [shape: f32[32,128], index: 6, kind: input, shape index: {}]   ;;  %s3076_s7 = inlined_call_operand.hbm [shape: f32[1,128], index: 7, kind: input, shape index: {}]   ;;  %s3077_s8 = inlined_call_operand.vmem [shape: f32[32,128], index: 8, kind: input, shape index: {}]   ;;  %s3078_s9 = inlined_call_operand.hbm [shape: f32[1,128], index: 9, kind: input, shape index: {}]   ;;  %s3079_s10 = inlined_call_operand.vmem [shape: f32[16,128], index: 10, kind: output, shape index: {}]  }
   0x1   :  { %16 = vsyncpa [#allocation6], 0 }
   0x2   :  { %17 = vsyncpa [#allocation9], 0  ;;  %s2647_s13 = smov [#allocation5]   ;;  %s2648_s15 = smov [#allocation3]  }
   0x3   :  { %s43_s14 = sshll.u32 %s2647_s13, 4  ;;  %s27_s16 = sshll.u32 %s2648_s15, 4  ;;  %s44_s14 = int_to_ptr.vmem [resolvable:$true] %s43_s14  ;;  %s2713_s16 = int_to_ptr.vmem [resolvable:$true] %s27_s16 }
   0x4   :  { %s2553_s19 = scalar_lea.hbm %s3074_s5, 384 }
   0x5   :  { %p2554_p0 = scmp.ne.s32.totalorder %s3074_s5, %s2553_s19  ;;  %p2557_p1 = scmp.lt.u32.totalorder %s2553_s19, %s3074_s5 }
   0x7   :  { %p2559_p2 = pnand %p2557_p1, %p2554_p0 }
   0x9   :  { %2562 = shalt.err (!%p2559_p2)
}
   0xa   :  { %s2563_s24 = scalar_lea.vmem %s44_s14, 384  ;;  %p2568_p4 = scmp.lt.s32.totalorder %s44_s14, %s44_s14 }
   0xb   :  { %p2564_p3 = scmp.ne.s32.totalorder %s44_s14, %s2563_s24  ;;  %p2569_p5 = scmp.lt.s32.totalorder %s2563_s24, %s2563_s24 }
   0xd   :  { %p2570_p6 = por %p2569_p5, %p2568_p4 }
   0xf   :  { %p2571_p7 = pnand %p2570_p6, %p2564_p3 }
  0x11   :  { %2574 = shalt.err (!%p2571_p7)
}
  0x12   :  { %s2649_s25 = smov 128   ;;  %s2650_s26 = smov 8  }
  0x13   :  { %49 = dma.hbm_to_vmem [thread:$0]  %s3074_s5, 384, %s44_s14, [#allocation6], %s2649_s25, %s2649_s25, %s2650_s26  }
  0x14   :  { %s2575_s11 = scalar_lea.hbm %s3071_s2, 256 }
  0x15   :  { %p2576_p8 = scmp.ne.s32.totalorder %s3071_s2, %s2575_s11  ;;  %p2579_p9 = scmp.lt.u32.totalorder %s2575_s11, %s3071_s2 }
  0x17   :  { %p2581_p10 = pnand %p2579_p9, %p2576_p8 }
  0x19   :  { %2584 = shalt.err (!%p2581_p10)
}
  0x1a   :  { %s2585_s18 = scalar_lea.vmem %s2713_s16, 256  ;;  %p2590_p12 = scmp.lt.s32.totalorder %s2713_s16, %s2713_s16 }
  0x1b   :  { %p2586_p11 = scmp.ne.s32.totalorder %s2713_s16, %s2585_s18  ;;  %p2591_p13 = scmp.lt.s32.totalorder %s2585_s18, %s2585_s18 }
  0x1d   :  { %p2592_p0 = por %p2591_p13, %p2590_p12 }
  0x1f   :  { %p2593_p1 = pnand %p2592_p0, %p2586_p11 }
  0x21   :  { %2596 = shalt.err (!%p2593_p1)
}
  0x22   :  { %33 = dma.hbm_to_vmem [thread:$0]  %s3071_s2, 256, %s2713_s16, [#allocation4], %s2649_s25, %s2649_s25, %s2650_s26  }
  0x23   :  { %s2651_s19 = smov [#allocation7]   ;;  %s2652_s21 = smov [#allocation8]  }
  0x24   :  { %s58_s20 = sshll.u32 %s2651_s19, 4  ;;  %s70_s22 = sshll.u32 %s2652_s21, 4  ;;  %s59_s20 = int_to_ptr.vmem [resolvable:$true] %s58_s20  ;;  %s71_s22 = int_to_ptr.vmem [resolvable:$true] %s70_s22 }
  0x25   :  { %s2597_s27 = scalar_lea.hbm %s3076_s7, 16 }
  0x26   :  { %p2598_p2 = scmp.ne.s32.totalorder %s3076_s7, %s2597_s27  ;;  %p2601_p3 = scmp.lt.u32.totalorder %s2597_s27, %s3076_s7 }
  0x28   :  { %p2603_p4 = pnand %p2601_p3, %p2598_p2 }
  0x2a   :  { %2606 = shalt.err (!%p2603_p4)
}
  0x2b   :  { %s2607_s2 = scalar_lea.vmem %s59_s20, 16  ;;  %s2611_s16 = scalar_lea.vmem %s59_s20, 32 }
  0x2c   :  { %p2608_p5 = scmp.ne.s32.totalorder %s59_s20, %s2607_s2  ;;  %p2612_p6 = scmp.lt.s32.totalorder %s59_s20, %s59_s20 }
  0x2d   :  { %p2613_p7 = scmp.lt.s32.totalorder %s2611_s16, %s2607_s2 }
  0x2f   :  { %p2614_p8 = por %p2613_p7, %p2612_p6 }
  0x31   :  { %p2615_p9 = pnand %p2614_p8, %p2608_p5 }
  0x33   :  { %2618 = shalt.err (!%p2615_p9)
}
  0x34   :  { %61 = dma.hbm_to_vmem [thread:$0]  %s3076_s7, 16, %s59_s20, [#allocation6]  }
  0x35   :  { %s2619_s15 = scalar_lea.hbm %s3078_s9, 16 }
  0x36   :  { %p2620_p10 = scmp.ne.s32.totalorder %s3078_s9, %s2619_s15  ;;  %p2623_p11 = scmp.lt.u32.totalorder %s2619_s15, %s3078_s9 }
  0x38   :  { %p2625_p12 = pnand %p2623_p11, %p2620_p10 }
  0x3a   :  { %2628 = shalt.err (!%p2625_p12)
}
  0x3b   :  { %s2629_s19 = scalar_lea.vmem %s71_s22, 16  ;;  %s2633_s21 = scalar_lea.vmem %s71_s22, 32 }
  0x3c   :  { %p2630_p13 = scmp.ne.s32.totalorder %s71_s22, %s2629_s19  ;;  %p2634_p0 = scmp.lt.s32.totalorder %s71_s22, %s71_s22 }
  0x3d   :  { %p2635_p1 = scmp.lt.s32.totalorder %s2633_s21, %s2629_s19 }
  0x3f   :  { %p2636_p2 = por %p2635_p1, %p2634_p0 }
  0x41   :  { %p2637_p3 = pnand %p2636_p2, %p2630_p13 }
  0x43   :  { %2640 = shalt.err (!%p2637_p3)
}
  0x44   :  { %73 = dma.hbm_to_vmem [thread:$0]  %s3078_s9, 16, %s71_s22, [#allocation9]  }
  0x45   :  { %2641 = dma.done.wait [#allocation4], 256  }
  0x46   :  { %2642 = vsyncadd [#allocation4], 4294967040 }
  0x47   :  { %2643 = dma.done.wait [#allocation6], 400  }
  0x48   :  { %2644 = vsyncadd [#allocation6], 4294966896 }
  0x49   :  { %2645 = dma.done.wait [#allocation9], 16  }
  0x4a   :  { %2646 = vsyncadd [#allocation9], 4294967280  ;;  %v2653_v0 = vmov 0.0|0.0   ;;  %vm2654_vm0 = vmmov 0   ;;  %v2655_v1 = vmov 0.0   ;;  %vm97_vm1 = vcmask 130048  }
  0x4b   :  { %2374 = vmatprep.subr.bf16.mxu0 %v2653_v0  ;;  %2187 = vmatprep.mubr.msk.f32.mxu0 %vm2654_vm0, %v2655_v1  ;;  %v88_v2 = vld [vmem:[#allocation3] sm:$0xff]  ;;  %v89_v3 = vld [vmem:[#allocation3 + $0x8] sm:$0xff]  ;;  %v273_v4 = vld [vmem:[%s3072_s3] sm:$0xff]  ;;  %s2656_s26 = smov 32   ;;  %vm191_vm2 = vcmask 195584   ;;  %vm281_vm3 = vcmask 261120  }
  0x4c   :  { %v2366_v5 = vpack.c.bf16 %v89_v3, %v88_v2  ;;  %v274_v6 = vld [vmem:[%s3072_s3 + $0x8] sm:$0xff]  ;;  %v86_v7 = vld [vmem:[%s3069_s0] sm:$0xff]  ;;  %v275_v9 = vld [vmem:[%s3072_s3 + $0x10] sm:$0xff]  ;;  %vm1196_vm4 = vcmask 254976   ;;  %vm1301_vm5 = vcmask 257026   ;;  %vm1517_vm6 = vcmask 261126  }
  0x4d   :  { %v2780_v8 = vpack.c.bf16 %v274_v6, %v273_v4  ;;  %2167 = vmatprep.mubr.msk.f32.mxu1 %vm97_vm1, %v86_v7  ;;  %v276_v10 = vld [vmem:[%s3072_s3 + $0x18] sm:$0xff]  ;;  %v87_v11 = vld [vmem:[%s3069_s0 + $0x8] sm:$0xff]  ;;  %v2044_v13 = vld [vmem:[%s3073_s4] ss:$0 sm:$0xff]  ;;  %vm1409_vm7 = vcmask 259076  }
  0x4e   :  { %2367 = vmatprep.subr.bf16.mxu1 %v2366_v5  ;;  %v2793_v12 = vpack.c.bf16 %v276_v10, %v275_v9  ;;  %v181_v29 = vld [vmem:[#allocation5] sm:$0xff]  ;;  %v182_v30 = vld [vmem:[#allocation5 + $0x8] sm:$0xff]  ;;  %v183_v33 = vld [vmem:[#allocation5 + $0x10] sm:$0xff] }
  0x4f   :  { %2376 = vmatpush3.bf16.msra.mxu0 %v2780_v8  ;;  %2369 = vmatpush3.bf16.msra.mxu1 %v2366_v5  ;;  %v2370_v31 = vpack.c.bf16 %v182_v30, %v181_v29  ;;  %v179_v32 = vld [vmem:[%s3070_s1] sm:$0xff]  ;;  %v180_v34 = vld [vmem:[%s3070_s1 + $0x8] sm:$0xff]  ;;  %s2657_s1 = smov 64   ;;  %v2831_v38 = vld [vmem:[#allocation7] ss:$0 sm:$0xff] }
  0x50   :  { %2377 = vmatprep.subr.bf16.mxu0 %v2653_v0 }
  0x51   :  { %2371 = vmatprep.subr.bf16.mxu1 %v2370_v31 }
  0x52   :  { %2168 = vmatmul.mubr.msk.f32.vlgmr.msra.gmra.mrb[0].mxu1 %vm97_vm1, %v87_v11 }
  0x53   :  { %2379 = vmatpush3.bf16.msra.mxu0 %v2793_v12  ;;  %2176 = vmatprep.mubr.msk.f32.mxu1 %vm191_vm2, %v179_v32 }
  0x54   :  { %2386 = vmatprep.subr.bf16.mxu0 %v2653_v0  ;;  %2373 = vmatpush3.bf16.msra.mxu1 %v2370_v31 }
  0x55   :  { %2174 = vmatprep.subr.mxu1 %v183_v33 }
  0x56   :  { %2188 = vmatmul.mubr.f32.vlgmr.msra.gmra.mrb[0].mxu0 %v2655_v1 }
  0x57   :  { %2388 = vmatpush3.bf16.msra.mxu0 %v2780_v8  ;;  %2209 = vmatprep.mubr.msk.f32.mxu0 %vm2654_vm0, %v2655_v1 }
  0x58   :  { %2389 = vmatprep.subr.bf16.mxu0 %v2653_v0  ;;  %2175 = vmatpush3.msra.mxu1 %v183_v33 }
  0x59   :  { %2177 = vmatmul.mubr.msk.f32.vlgmr.msra.gmra.mrb[2].mxu1 %vm191_vm2, %v180_v34  ;;  %2380 = vmatprep.subr.bf16.mxu1 %v2653_v0 }
  0x5a   :  { %2382 = vmatpush3.bf16.msra.mxu1 %v2780_v8  ;;  %2198 = vmatprep.mubr.msk.f32.mxu1 %vm2654_vm0, %v2655_v1 }
  0x5b   :  { %2391 = vmatpush3.bf16.msra.mxu0 %v2793_v12  ;;  %2383 = vmatprep.subr.bf16.mxu1 %v2653_v0 }
  0x5c   :  { %2398 = vmatprep.subr.bf16.mxu0 %v2653_v0 }
  0x5e   :  { %2385 = vmatpush3.bf16.msra.mxu1 %v2793_v12 }
  0x5f   :  { %2392 = vmatprep.subr.bf16.mxu1 %v2653_v0 }
 0x125   :  { %v2169_v14 = vpop.f32.mrb[0].mxu1 }
 0x126   :  { %v2809_v15 = vadd.f32 %v2169_v14, %v2044_v13  ;;  %v170_v16 = vpop.f32.mrb[1].mxu1 }
 0x127   :  { %v2811_v17 = vadd.f32 %v2044_v13, %v170_v16 }
 0x129   :  { %v351_v18 = vpop.f32.mrb[0].mxu0 }
 0x12a   :  { %v355_v19 = vadd.f32 %v351_v18, %v2811_v17  ;;  %v2189_v20 = vpop.f32.mrb[1].mxu0 }
 0x12c   :  { %2489 = vtanh.f32 %v355_v19  ;;  %v2178_v39 = vpop.f32.mrb[2].mxu1 }
 0x12d   :  { %v2834_v40 = vadd.f32 %v2178_v39, %v2831_v38  ;;  %v2836_v41 = vpop.f32.mrb[3].mxu1 }
 0x136   :  { %v2490_v21 = vpop.eup %2489 }
 0x137   :  { %361 = vrot.lane.b32.xlu0 %v2490_v21, %s2656_s26  ;;  %v357_v22 = vmul.f32 0.5, %v2490_v21 }
 0x139   :  { %v358_v23 = vadd.f32 0.5, %v357_v22 }
 0x13b   :  { %v359_v26 = vmul.f32 0.0, %v358_v23 }
 0x1a9   :  { %v362_v24 = vpop.permute.xlu0 %361 }
 0x1aa   :  { %v364_v25 = vmul.f32 %v362_v24, %v358_v23 }
 0x1ac   :  { %366 = vrot.lane.b32.xlu0 %v364_v25, %s2656_s26 }
 0x21e   :  { %v367_v27 = vpop.permute.xlu0 %366 }
 0x21f   :  { %v369_v28 = vadd.f32 %v367_v27, %v359_v26 }
 0x221   :  { %2491 = vtanh.f32 %v369_v28  ;;  %v459_v52 = vrot.slane %v369_v28, 6 }
 0x22b   :  { %v2492_v35 = vpop.eup %2491 }
 0x22c   :  { %372 = vrot.lane.b32.xlu1 %v2492_v35, %s2656_s26 }
 0x29e   :  { %v373_v36 = vpop.permute.xlu1 %372 }
 0x29f   :  { %v375_v37 = vmul.f32 %v373_v36, %v358_v23 }
 0x2a1   :  { %377 = vrot.lane.b32.xlu1 %v375_v37, %s2657_s1 }
 0x313   :  { %v378_v42 = vpop.permute.xlu1 %377 }
 0x314   :  { %2199 = vmatmul.mubr.msk.f32.vlgmr.msra.gmra.mrb[4].mxu1 %vm281_vm3, %v378_v42 }
 0x315   :  { %2394 = vmatpush3.bf16.msra.mxu1 %v2780_v8  ;;  %2220 = vmatprep.mubr.msk.f32.mxu1 %vm2654_vm0, %v2655_v1 }
 0x316   :  { %2395 = vmatprep.subr.bf16.mxu1 %v2653_v0 }
 0x319   :  { %2397 = vmatpush3.bf16.msra.mxu1 %v2793_v12 }
 0x31a   :  { %2404 = vmatprep.subr.bf16.mxu1 %v2653_v0 }
 0x3e7   :  { %v447_v43 = vpop.f32.mrb[4].mxu1 }
 0x3e8   :  { %v452_v44 = vrot.slane %v447_v43, 6  ;;  %v2200_v45 = vpop.f32.mrb[5].mxu1 }
 0x3ea   :  { %v454_v46 = vadd.f32 %v452_v44, %v2811_v17 }
 0x3ec   :  { %2493 = vtanh.f32 %v454_v46 }
 0x3f6   :  { %v2494_v47 = vpop.eup %2493 }
 0x3f7   :  { %463 = vrot.lane.b32.xlu0 %v2494_v47, %s2656_s26  ;;  %v456_v48 = vmul.f32 0.5, %v2494_v47 }
 0x3f9   :  { %v457_v49 = vadd.f32 0.5, %v456_v48 }
 0x3fb   :  { %v461_v53 = vmul.f32 %v459_v52, %v457_v49 }
 0x469   :  { %v464_v50 = vpop.permute.xlu0 %463 }
 0x46a   :  { %v466_v51 = vmul.f32 %v464_v50, %v457_v49 }
 0x46c   :  { %468 = vrot.lane.b32.xlu1 %v466_v51, %s2656_s26 }
 0x4de   :  { %v469_v54 = vpop.permute.xlu1 %468 }
 0x4df   :  { %v471_v55 = vadd.f32 %v469_v54, %v461_v53 }
 0x4e1   :  { %2495 = vtanh.f32 %v471_v55  ;;  %v562_v9 = vrot.slane %v471_v55, 6 }
 0x4eb   :  { %v2496_v56 = vpop.eup %2495 }
 0x4ec   :  { %474 = vrot.lane.b32.xlu0 %v2496_v56, %s2656_s26 }
 0x55e   :  { %v475_v57 = vpop.permute.xlu0 %474 }
 0x55f   :  { %v477_v58 = vmul.f32 %v475_v57, %v457_v49 }
 0x561   :  { %v479_v59 = vrot.slane %v477_v58, 2 }
 0x563   :  { %480 = vrot.lane.b32.xlu1 %v479_v59, %s2657_s1 }
 0x5d5   :  { %v481_v60 = vpop.permute.xlu1 %480 }
 0x5d6   :  { %2210 = vmatmul.mubr.msk.f32.vlgmr.msra.gmra.mrb[2].mxu0 %vm281_vm3, %v481_v60 }
 0x5d7   :  { %2400 = vmatpush3.bf16.msra.mxu0 %v2780_v8  ;;  %2231 = vmatprep.mubr.msk.f32.mxu0 %vm2654_vm0, %v2655_v1 }
 0x5d8   :  { %2401 = vmatprep.subr.bf16.mxu0 %v2653_v0 }
 0x5db   :  { %2403 = vmatpush3.bf16.msra.mxu0 %v2793_v12 }
 0x5dc   :  { %2410 = vmatprep.subr.bf16.mxu0 %v2653_v0 }
 0x6a9   :  { %v550_v61 = vpop.f32.mrb[2].mxu0 }
 0x6aa   :  { %v555_v62 = vrot.slane %v550_v61, 4  ;;  %v2211_v63 = vpop.f32.mrb[3].mxu0 }
 0x6ac   :  { %v557_v2 = vadd.f32 %v555_v62, %v2811_v17 }
 0x6ae   :  { %2497 = vtanh.f32 %v557_v2 }
 0x6b8   :  { %v2498_v3 = vpop.eup %2497 }
 0x6b9   :  { %566 = vrot.lane.b32.xlu0 %v2498_v3, %s2656_s26  ;;  %v559_v4 = vmul.f32 0.5, %v2498_v3 }
 0x6bb   :  { %v560_v5 = vadd.f32 0.5, %v559_v4 }
 0x6bd   :  { %v564_v10 = vmul.f32 %v562_v9, %v560_v5 }
 0x72b   :  { %v567_v6 = vpop.permute.xlu0 %566 }
 0x72c   :  { %v569_v7 = vmul.f32 %v567_v6, %v560_v5 }
 0x72e   :  { %571 = vrot.lane.b32.xlu1 %v569_v7, %s2656_s26 }
 0x7a0   :  { %v572_v11 = vpop.permute.xlu1 %571 }
 0x7a1   :  { %v574_v13 = vadd.f32 %v572_v11, %v564_v10 }
 0x7a3   :  { %2499 = vtanh.f32 %v574_v13  ;;  %v665_v30 = vrot.slane %v574_v13, 6 }
 0x7ad   :  { %v2500_v14 = vpop.eup %2499 }
 0x7ae   :  { %577 = vrot.lane.b32.xlu0 %v2500_v14, %s2656_s26 }
 0x820   :  { %v578_v16 = vpop.permute.xlu0 %577 }
 0x821   :  { %v580_v18 = vmul.f32 %v578_v16, %v560_v5 }
 0x823   :  { %v582_v19 = vrot.slane %v580_v18, 4 }
 0x825   :  { %583 = vrot.lane.b32.xlu1 %v582_v19, %s2657_s1 }
 0x897   :  { %v584_v20 = vpop.permute.xlu1 %583 }
 0x898   :  { %2221 = vmatmul.mubr.msk.f32.vlgmr.msra.gmra.mrb[6].mxu1 %vm281_vm3, %v584_v20 }
 0x899   :  { %2406 = vmatpush3.bf16.msra.mxu1 %v2780_v8  ;;  %2242 = vmatprep.mubr.msk.f32.mxu1 %vm2654_vm0, %v2655_v1 }
 0x89a   :  { %2407 = vmatprep.subr.bf16.mxu1 %v2653_v0 }
 0x89d   :  { %2409 = vmatpush3.bf16.msra.mxu1 %v2793_v12 }
 0x89e   :  { %2416 = vmatprep.subr.bf16.mxu1 %v2653_v0 }
 0x96b   :  { %v653_v21 = vpop.f32.mrb[6].mxu1 }
 0x96c   :  { %v658_v22 = vrot.slane %v653_v21, 2  ;;  %v2222_v23 = vpop.f32.mrb[7].mxu1 }
 0x96e   :  { %v660_v24 = vadd.f32 %v658_v22, %v2811_v17 }
 0x970   :  { %2501 = vtanh.f32 %v660_v24 }
 0x97a   :  { %v2502_v25 = vpop.eup %2501 }
 0x97b   :  { %669 = vrot.lane.b32.xlu0 %v2502_v25, %s2656_s26  ;;  %v662_v26 = vmul.f32 0.5, %v2502_v25 }
 0x97d   :  { %v663_v27 = vadd.f32 0.5, %v662_v26 }
 0x97f   :  { %v667_v31 = vmul.f32 %v665_v30, %v663_v27 }
 0x9ed   :  { %v670_v28 = vpop.permute.xlu0 %669 }
 0x9ee   :  { %v672_v29 = vmul.f32 %v670_v28, %v663_v27 }
 0x9f0   :  { %674 = vrot.lane.b32.xlu1 %v672_v29, %s2656_s26 }
 0xa62   :  { %v675_v32 = vpop.permute.xlu1 %674 }
 0xa63   :  { %v677_v33 = vadd.f32 %v675_v32, %v667_v31 }
 0xa65   :  { %2503 = vtanh.f32 %v677_v33  ;;  %v765_v49 = vrot.slane %v677_v33, 6 }
 0xa6f   :  { %v2504_v34 = vpop.eup %2503 }
 0xa70   :  { %680 = vrot.lane.b32.xlu0 %v2504_v34, %s2656_s26 }
 0xae2   :  { %v681_v35 = vpop.permute.xlu0 %680 }
 0xae3   :  { %v683_v17 = vmul.f32 %v681_v35, %v663_v27 }
 0xae5   :  { %v685_v36 = vrot.slane %v683_v17, 6 }
 0xae7   :  { %686 = vrot.lane.b32.xlu1 %v685_v36, %s2657_s1 }
 0xb59   :  { %v687_v37 = vpop.permute.xlu1 %686 }
 0xb5a   :  { %2232 = vmatmul.mubr.msk.f32.vlgmr.msra.gmra.mrb[4].mxu0 %vm281_vm3, %v687_v37 }
 0xb5b   :  { %2412 = vmatpush3.bf16.msra.mxu0 %v2780_v8  ;;  %2253 = vmatprep.mubr.msk.f32.mxu0 %vm2654_vm0, %v2655_v1 }
 0xb5c   :  { %2413 = vmatprep.subr.bf16.mxu0 %v2653_v0 }
 0xb5f   :  { %2415 = vmatpush3.bf16.msra.mxu0 %v2793_v12 }
 0xb60   :  { %2422 = vmatprep.subr.bf16.mxu0 %v2653_v0 }
 0xc2d   :  { %v756_v39 = vpop.f32.mrb[4].mxu0 }
 0xc2e   :  { %v760_v42 = vadd.f32 %v756_v39, %v2809_v15  ;;  %v2233_v43 = vpop.f32.mrb[5].mxu0 }
 0xc30   :  { %2505 = vtanh.f32 %v760_v42 }
 0xc3a   :  { %v2506_v44 = vpop.eup %2505 }
 0xc3b   :  { %769 = vrot.lane.b32.xlu0 %v2506_v44, %s2656_s26  ;;  %v762_v45 = vmul.f32 0.5, %v2506_v44 }
 0xc3d   :  { %v763_v46 = vadd.f32 0.5, %v762_v45 }
 0xc3f   :  { %v767_v50 = vmul.f32 %v765_v49, %v763_v46  ;;  %v279_v49 = vld [vmem:[%s3075_s6 + $0x10] sm:$0xff] }
 0xcad   :  { %v770_v47 = vpop.permute.xlu0 %769 }
 0xcae   :  { %v772_v48 = vmul.f32 %v770_v47, %v763_v46 }
 0xcb0   :  { %774 = vrot.lane.b32.xlu1 %v772_v48, %s2656_s26  ;;  %v277_v48 = vld [vmem:[%s3075_s6] sm:$0xff] }
 0xd22   :  { %v775_v51 = vpop.permute.xlu1 %774 }
 0xd23   :  { %v777_v52 = vadd.f32 %v775_v51, %v767_v50  ;;  %v280_v51 = vld [vmem:[%s3075_s6 + $0x18] sm:$0xff] }
 0xd25   :  { %2507 = vtanh.f32 %v777_v52  ;;  %v867_v3 = vrot.slane %v777_v52, 6  ;;  %v2927_v52 = vpack.c.bf16 %v280_v51, %v279_v49 }
 0xd2f   :  { %v2508_v53 = vpop.eup %2507 }
 0xd30   :  { %780 = vrot.lane.b32.xlu0 %v2508_v53, %s2656_s26 }
 0xda2   :  { %v781_v54 = vpop.permute.xlu0 %780 }
 0xda3   :  { %v783_v55 = vmul.f32 %v781_v54, %v763_v46 }
 0xda5   :  { %785 = vrot.lane.b32.xlu1 %v783_v55, %s2657_s1 }
 0xe17   :  { %v786_v56 = vpop.permute.xlu1 %785 }
 0xe18   :  { %2243 = vmatmul.mubr.msk.f32.vlgmr.msra.gmra.mrb[8].mxu1 %vm281_vm3, %v786_v56 }
 0xe19   :  { %2418 = vmatpush3.bf16.msra.mxu1 %v2780_v8  ;;  %2264 = vmatprep.mubr.msk.f32.mxu1 %vm2654_vm0, %v2655_v1 }
 0xe1a   :  { %2419 = vmatprep.subr.bf16.mxu1 %v2653_v0 }
 0xe1d   :  { %2421 = vmatpush3.bf16.msra.mxu1 %v2793_v12 }
 0xe1e   :  { %2428 = vmatprep.subr.bf16.mxu1 %v2653_v0 }
 0xeeb   :  { %v855_v57 = vpop.f32.mrb[8].mxu1 }
 0xeec   :  { %v860_v58 = vrot.slane %v855_v57, 6  ;;  %v2244_v59 = vpop.f32.mrb[9].mxu1 }
 0xeee   :  { %v862_v60 = vadd.f32 %v860_v58, %v2809_v15  ;;  %v2947_v58 = vadd.f32 %v2831_v38, %v2836_v41 }
 0xef0   :  { %2509 = vtanh.f32 %v862_v60 }
 0xefa   :  { %v2510_v61 = vpop.eup %2509 }
 0xefb   :  { %871 = vrot.lane.b32.xlu0 %v2510_v61, %s2656_s26  ;;  %v864_v62 = vmul.f32 0.5, %v2510_v61 }
 0xefd   :  { %v865_v8 = vadd.f32 0.5, %v864_v62 }
 0xeff   :  { %v869_v4 = vmul.f32 %v867_v3, %v865_v8 }
 0xf6d   :  { %v872_v63 = vpop.permute.xlu0 %871 }
 0xf6e   :  { %v874_v2 = vmul.f32 %v872_v63, %v865_v8 }
 0xf70   :  { %876 = vrot.lane.b32.xlu1 %v874_v2, %s2656_s26 }
 0xfe2   :  { %v877_v12 = vpop.permute.xlu1 %876 }
 0xfe3   :  { %v879_v5 = vadd.f32 %v877_v12, %v869_v4 }
 0xfe5   :  { %2511 = vtanh.f32 %v879_v5  ;;  %v970_v24 = vrot.slane %v879_v5, 6 }
 0xfef   :  { %v2512_v6 = vpop.eup %2511 }
 0xff0   :  { %882 = vrot.lane.b32.xlu0 %v2512_v6, %s2656_s26 }
0x1062   :  { %v883_v7 = vpop.permute.xlu0 %882 }
0x1063   :  { %v885_v9 = vmul.f32 %v883_v7, %v865_v8 }
0x1065   :  { %v887_v10 = vrot.slane %v885_v9, 2 }
0x1067   :  { %888 = vrot.lane.b32.xlu1 %v887_v10, %s2657_s1 }
0x10d9   :  { %v889_v11 = vpop.permute.xlu1 %888 }
0x10da   :  { %2254 = vmatmul.mubr.msk.f32.vlgmr.msra.gmra.mrb[6].mxu0 %vm281_vm3, %v889_v11 }
0x10db   :  { %2275 = vmatprep.mubr.msk.f32.mxu0 %vm2654_vm0, %v2655_v1 }
0x11ad   :  { %v958_v13 = vpop.f32.mrb[6].mxu0 }
0x11ae   :  { %v963_v14 = vrot.slane %v958_v13, 4  ;;  %v2255_v16 = vpop.f32.mrb[7].mxu0 }
0x11b0   :  { %v965_v18 = vadd.f32 %v963_v14, %v2809_v15 }
0x11b2   :  { %2513 = vtanh.f32 %v965_v18 }
0x11bc   :  { %v2514_v19 = vpop.eup %2513 }
0x11bd   :  { %974 = vrot.lane.b32.xlu0 %v2514_v19, %s2656_s26  ;;  %v967_v20 = vmul.f32 0.5, %v2514_v19 }
0x11bf   :  { %v968_v21 = vadd.f32 0.5, %v967_v20 }
0x11c1   :  { %v972_v25 = vmul.f32 %v970_v24, %v968_v21 }
0x122f   :  { %v975_v22 = vpop.permute.xlu0 %974 }
0x1230   :  { %v977_v23 = vmul.f32 %v975_v22, %v968_v21 }
0x1232   :  { %979 = vrot.lane.b32.xlu1 %v977_v23, %s2656_s26 }
0x12a4   :  { %v980_v26 = vpop.permute.xlu1 %979 }
0x12a5   :  { %v982_v27 = vadd.f32 %v980_v26, %v972_v25 }
0x12a7   :  { %2515 = vtanh.f32 %v982_v27  ;;  %v1073_v44 = vrot.slane %v982_v27, 6 }
0x12b1   :  { %v2516_v28 = vpop.eup %2515 }
0x12b2   :  { %985 = vrot.lane.b32.xlu0 %v2516_v28, %s2656_s26 }
0x1324   :  { %v986_v29 = vpop.permute.xlu0 %985 }
0x1325   :  { %v988_v30 = vmul.f32 %v986_v29, %v968_v21 }
0x1327   :  { %v990_v31 = vrot.slane %v988_v30, 4 }
0x1329   :  { %991 = vrot.lane.b32.xlu1 %v990_v31, %s2657_s1 }
0x139b   :  { %v992_v32 = vpop.permute.xlu1 %991 }
0x139c   :  { %2265 = vmatmul.mubr.msk.f32.vlgmr.msra.gmra.mrb[10].mxu1 %vm281_vm3, %v992_v32 }
0x139d   :  { %2286 = vmatprep.mubr.msk.f32.mxu1 %vm2654_vm0, %v2655_v1 }
0x146f   :  { %v1061_v33 = vpop.f32.mrb[10].mxu1 }
0x1470   :  { %v1066_v34 = vrot.slane %v1061_v33, 2  ;;  %v2266_v35 = vpop.f32.mrb[11].mxu1 }
0x1472   :  { %v1068_v17 = vadd.f32 %v1066_v34, %v2809_v15  ;;  %v278_v15 = vld [vmem:[%s3075_s6 + $0x8] sm:$0xff] }
0x1473   :  { %v2921_v50 = vpack.c.bf16 %v278_v15, %v277_v48 }
0x1474   :  { %2517 = vtanh.f32 %v1068_v17 }
0x1475   :  { %2424 = vmatpush3.bf16.msra.mxu0 %v2921_v50  ;;  %2430 = vmatpush3.bf16.msra.mxu1 %v2921_v50 }
0x1476   :  { %2425 = vmatprep.subr.bf16.mxu0 %v2653_v0  ;;  %2431 = vmatprep.subr.bf16.mxu1 %v2653_v0 }
0x1479   :  { %2427 = vmatpush3.bf16.msra.mxu0 %v2927_v52  ;;  %2433 = vmatpush3.bf16.msra.mxu1 %v2927_v52 }
0x147a   :  { %2434 = vmatprep.subr.bf16.mxu0 %v2653_v0  ;;  %2440 = vmatprep.subr.bf16.mxu1 %v2653_v0 }
0x147e   :  { %v2518_v36 = vpop.eup %2517 }
0x147f   :  { %1077 = vrot.lane.b32.xlu0 %v2518_v36, %s2656_s26  ;;  %v1070_v37 = vmul.f32 0.5, %v2518_v36 }
0x1481   :  { %v1071_v39 = vadd.f32 0.5, %v1070_v37 }
0x1483   :  { %v1075_v45 = vmul.f32 %v1073_v44, %v1071_v39 }
0x14f1   :  { %v1078_v42 = vpop.permute.xlu0 %1077 }
0x14f2   :  { %v1080_v43 = vmul.f32 %v1078_v42, %v1071_v39 }
0x14f4   :  { %1082 = vrot.lane.b32.xlu1 %v1080_v43, %s2656_s26 }
0x1566   :  { %v1083_v46 = vpop.permute.xlu1 %1082 }
0x1567   :  { %v1085_v47 = vadd.f32 %v1083_v46, %v1075_v45 }
0x1569   :  { %2519 = vtanh.f32 %v1085_v47  ;;  %v1173_v4 = vrot.slane %v1085_v47, 6 }
0x1573   :  { %v2520_v53 = vpop.eup %2519 }
0x1574   :  { %1088 = vrot.lane.b32.xlu0 %v2520_v53, %s2656_s26 }
0x15e6   :  { %v1089_v54 = vpop.permute.xlu0 %1088 }
0x15e7   :  { %v1091_v55 = vmul.f32 %v1089_v54, %v1071_v39 }
0x15e9   :  { %v1093_v56 = vrot.slane %v1091_v55, 6 }
0x15eb   :  { %1094 = vrot.lane.b32.xlu1 %v1093_v56, %s2657_s1 }
0x165d   :  { %v1095_v57 = vpop.permute.xlu1 %1094 }
0x165e   :  { %2276 = vmatmul.mubr.msk.f32.vlgmr.msra.gmra.mrb[8].mxu0 %vm281_vm3, %v1095_v57 }
0x165f   :  { %2436 = vmatpush3.bf16.msra.mxu0 %v2921_v50  ;;  %2297 = vmatprep.mubr.msk.f32.mxu0 %vm2654_vm0, %v2655_v1 }
0x1660   :  { %2437 = vmatprep.subr.bf16.mxu0 %v2653_v0 }
0x1663   :  { %2439 = vmatpush3.bf16.msra.mxu0 %v2927_v52 }
0x1664   :  { %2446 = vmatprep.subr.bf16.mxu0 %v2653_v0 }
0x1731   :  { %v1164_v59 = vpop.f32.mrb[8].mxu0 }
0x1732   :  { %v1168_v60 = vadd.f32 %v1164_v59, %v2947_v58  ;;  %v2277_v61 = vpop.f32.mrb[9].mxu0 }
0x1734   :  { %2521 = vtanh.f32 %v1168_v60 }
0x173e   :  { %v2522_v62 = vpop.eup %2521 }
0x173f   :  { %1177 = vrot.lane.b32.xlu0 %v2522_v62, %s2656_s26  ;;  %v1170_v8 = vmul.f32 0.5, %v2522_v62 }
0x1741   :  { %v1171_v63 = vadd.f32 0.5, %v1170_v8 }
0x1743   :  { %v1175_v12 = vmul.f32 %v1173_v4, %v1171_v63 }
0x17b1   :  { %v1178_v2 = vpop.permute.xlu0 %1177 }
0x17b2   :  { %v1180_v3 = vmul.f32 %v1178_v2, %v1171_v63 }
0x17b4   :  { %1182 = vrot.lane.b32.xlu1 %v1180_v3, %s2656_s26 }
0x1826   :  { %v1183_v5 = vpop.permute.xlu1 %1182 }
0x1827   :  { %v1185_v6 = vadd.f32 %v1183_v5, %v1175_v12 }
0x1829   :  { %2523 = vtanh.f32 %v1185_v6  ;;  %v1278_v22 = vrot.slane %v1185_v6, 6 }
0x1833   :  { %v2524_v38 = vpop.eup %2523 }
0x1834   :  { %1188 = vrot.lane.b32.xlu0 %v2524_v38, %s2656_s26 }
0x18a6   :  { %v1189_v41 = vpop.permute.xlu0 %1188 }
0x18a7   :  { %v1191_v7 = vmul.f32 %v1189_v41, %v1171_v63 }
0x18a9   :  { %1193 = vrot.lane.b32.xlu1 %v1191_v7, %s2657_s1 }
0x191b   :  { %v1194_v9 = vpop.permute.xlu1 %1193 }
0x191c   :  { %1197 = vst.msk [vmem:[#allocation2] sm:$0x3] %vm1196_vm4, %v1194_v9  ;;  %2287 = vmatmul.mubr.msk.f32.vlgmr.msra.gmra.mrb[12].mxu1 %vm281_vm3, %v1194_v9 }
0x191d   :  { %2442 = vmatpush3.bf16.msra.mxu1 %v2921_v50  ;;  %2308 = vmatprep.mubr.msk.f32.mxu1 %vm2654_vm0, %v2655_v1 }
0x191e   :  { %2443 = vmatprep.subr.bf16.mxu1 %v2653_v0 }
0x1921   :  { %2445 = vmatpush3.bf16.msra.mxu1 %v2927_v52 }
0x1922   :  { %2452 = vmatprep.subr.bf16.mxu1 %v2653_v0 }
0x19ef   :  { %v1266_v10 = vpop.f32.mrb[12].mxu1 }
0x19f0   :  { %v1271_v11 = vrot.slane %v1266_v10, 6  ;;  %v2288_v13 = vpop.f32.mrb[13].mxu1 }
0x19f2   :  { %v1273_v14 = vadd.f32 %v1271_v11, %v2947_v58 }
0x19f4   :  { %2525 = vtanh.f32 %v1273_v14 }
0x19fe   :  { %v2526_v16 = vpop.eup %2525 }
0x19ff   :  { %1282 = vrot.lane.b32.xlu0 %v2526_v16, %s2656_s26  ;;  %v1275_v18 = vmul.f32 0.5, %v2526_v16 }
0x1a01   :  { %v1276_v19 = vadd.f32 0.5, %v1275_v18 }
0x1a03   :  { %v1280_v23 = vmul.f32 %v1278_v22, %v1276_v19 }
0x1a71   :  { %v1283_v20 = vpop.permute.xlu0 %1282 }
0x1a72   :  { %v1285_v21 = vmul.f32 %v1283_v20, %v1276_v19 }
0x1a74   :  { %1287 = vrot.lane.b32.xlu1 %v1285_v21, %s2656_s26 }
0x1ae6   :  { %v1288_v24 = vpop.permute.xlu1 %1287 }
0x1ae7   :  { %v1290_v25 = vadd.f32 %v1288_v24, %v1280_v23 }
0x1ae9   :  { %2527 = vtanh.f32 %v1290_v25  ;;  %v1386_v42 = vrot.slane %v1290_v25, 6 }
0x1af3   :  { %v2528_v26 = vpop.eup %2527 }
0x1af4   :  { %1293 = vrot.lane.b32.xlu0 %v2528_v26, %s2656_s26 }
0x1b66   :  { %v1294_v27 = vpop.permute.xlu0 %1293 }
0x1b67   :  { %v2966_v28 = vmul.f32 %v1294_v27, %v1276_v19 }
0x1b69   :  { %v1303_v29 = vrot.slane %v2966_v28, 2 }
0x1b6b   :  { %1304 = vrot.lane.b32.xlu1 %v1303_v29, %s2657_s1 }
0x1bdd   :  { %v1305_v30 = vpop.permute.xlu1 %1304 }
0x1bde   :  { %2298 = vmatmul.mubr.msk.f32.vlgmr.msra.gmra.mrb[10].mxu0 %vm281_vm3, %v1305_v30 }
0x1bdf   :  { %2448 = vmatpush3.bf16.msra.mxu0 %v2921_v50  ;;  %2319 = vmatprep.mubr.msk.f32.mxu0 %vm2654_vm0, %v2655_v1 }
0x1be0   :  { %2449 = vmatprep.subr.bf16.mxu0 %v2653_v0 }
0x1be3   :  { %2451 = vmatpush3.bf16.msra.mxu0 %v2927_v52 }
0x1be4   :  { %2458 = vmatprep.subr.bf16.mxu0 %v2653_v0 }
0x1cb1   :  { %v1374_v31 = vpop.f32.mrb[10].mxu0 }
0x1cb2   :  { %v1379_v32 = vrot.slane %v1374_v31, 4  ;;  %v2299_v33 = vpop.f32.mrb[11].mxu0 }
0x1cb4   :  { %v1381_v34 = vadd.f32 %v1379_v32, %v2947_v58 }
0x1cb6   :  { %2529 = vtanh.f32 %v1381_v34 }
0x1cc0   :  { %v2530_v35 = vpop.eup %2529 }
0x1cc1   :  { %1390 = vrot.lane.b32.xlu0 %v2530_v35, %s2656_s26  ;;  %v1383_v17 = vmul.f32 0.5, %v2530_v35 }
0x1cc3   :  { %v1384_v36 = vadd.f32 0.5, %v1383_v17 }
0x1cc5   :  { %v1388_v43 = vmul.f32 %v1386_v42, %v1384_v36 }
0x1d33   :  { %v1391_v37 = vpop.permute.xlu0 %1390 }
0x1d34   :  { %v1393_v39 = vmul.f32 %v1391_v37, %v1384_v36 }
0x1d36   :  { %1395 = vrot.lane.b32.xlu1 %v1393_v39, %s2656_s26 }
0x1da8   :  { %v1396_v44 = vpop.permute.xlu1 %1395 }
0x1da9   :  { %v1398_v45 = vadd.f32 %v1396_v44, %v1388_v43 }
0x1dab   :  { %2531 = vtanh.f32 %v1398_v45  ;;  %v1494_v62 = vrot.slane %v1398_v45, 6 }
0x1db5   :  { %v2532_v46 = vpop.eup %2531 }
0x1db6   :  { %1401 = vrot.lane.b32.xlu0 %v2532_v46, %s2656_s26 }
0x1e28   :  { %v1402_v47 = vpop.permute.xlu0 %1401 }
0x1e29   :  { %v2981_v48 = vmul.f32 %v1402_v47, %v1384_v36 }
0x1e2b   :  { %v1411_v15 = vrot.slane %v2981_v48, 4 }
0x1e2d   :  { %1412 = vrot.lane.b32.xlu1 %v1411_v15, %s2657_s1 }
0x1e9f   :  { %v1413_v49 = vpop.permute.xlu1 %1412 }
0x1ea0   :  { %2309 = vmatmul.mubr.msk.f32.vlgmr.msra.gmra.mrb[14].mxu1 %vm281_vm3, %v1413_v49 }
0x1ea1   :  { %2454 = vmatpush3.bf16.msra.mxu1 %v2921_v50  ;;  %2330 = vmatprep.mubr.msk.f32.mxu1 %vm2654_vm0, %v2655_v1 }
0x1ea2   :  { %2455 = vmatprep.subr.bf16.mxu1 %v2653_v0 }
0x1ea5   :  { %2457 = vmatpush3.bf16.msra.mxu1 %v2927_v52 }
0x1ea6   :  { %2464 = vmatprep.subr.bf16.mxu1 %v2653_v0 }
0x1f73   :  { %v1482_v51 = vpop.f32.mrb[14].mxu1 }
0x1f74   :  { %v1487_v53 = vrot.slane %v1482_v51, 2  ;;  %v2310_v54 = vpop.f32.mrb[15].mxu1 }
0x1f76   :  { %v1489_v55 = vadd.f32 %v1487_v53, %v2947_v58 }
0x1f78   :  { %2533 = vtanh.f32 %v1489_v55 }
0x1f82   :  { %v2534_v56 = vpop.eup %2533 }
0x1f83   :  { %1498 = vrot.lane.b32.xlu0 %v2534_v56, %s2656_s26  ;;  %v1491_v57 = vmul.f32 0.5, %v2534_v56 }
0x1f85   :  { %v1492_v59 = vadd.f32 0.5, %v1491_v57 }
0x1f87   :  { %v1496_v8 = vmul.f32 %v1494_v62, %v1492_v59 }
0x1ff5   :  { %v1499_v60 = vpop.permute.xlu0 %1498 }
0x1ff6   :  { %v1501_v61 = vmul.f32 %v1499_v60, %v1492_v59 }
0x1ff8   :  { %1503 = vrot.lane.b32.xlu1 %v1501_v61, %s2656_s26 }
0x206a   :  { %v1504_v63 = vpop.permute.xlu1 %1503 }
0x206b   :  { %v1506_v2 = vadd.f32 %v1504_v63, %v1496_v8 }
0x206d   :  { %2535 = vtanh.f32 %v1506_v2  ;;  %v1599_v14 = vrot.slane %v1506_v2, 6 }
0x2077   :  { %v2536_v3 = vpop.eup %2535 }
0x2078   :  { %1509 = vrot.lane.b32.xlu0 %v2536_v3, %s2656_s26 }
0x20ea   :  { %v1510_v4 = vpop.permute.xlu0 %1509 }
0x20eb   :  { %v2996_v58 = vmul.f32 %v1510_v4, %v1492_v59 }
0x20ed   :  { %v1519_v12 = vrot.slane %v2996_v58, 6 }
0x20ef   :  { %1520 = vrot.lane.b32.xlu1 %v1519_v12, %s2657_s1 }
0x2161   :  { %v1521_v5 = vpop.permute.xlu1 %1520 }
0x2162   :  { %2320 = vmatmul.mubr.msk.f32.vlgmr.msra.gmra.mrb[12].mxu0 %vm281_vm3, %v1521_v5 }
0x2163   :  { %2460 = vmatpush3.bf16.msra.mxu0 %v2921_v50  ;;  %2341 = vmatprep.mubr.msk.f32.mxu0 %vm2654_vm0, %v2655_v1 }
0x2164   :  { %2461 = vmatprep.subr.bf16.mxu0 %v2653_v0 }
0x2167   :  { %2463 = vmatpush3.bf16.msra.mxu0 %v2927_v52 }
0x2235   :  { %v1590_v6 = vpop.f32.mrb[12].mxu0 }
0x2236   :  { %v1594_v38 = vadd.f32 %v1590_v6, %v2834_v40  ;;  %v2321_v41 = vpop.f32.mrb[13].mxu0 }
0x2238   :  { %2537 = vtanh.f32 %v1594_v38 }
0x2242   :  { %v2538_v7 = vpop.eup %2537 }
0x2243   :  { %1603 = vrot.lane.b32.xlu0 %v2538_v7, %s2656_s26  ;;  %v1596_v9 = vmul.f32 0.5, %v2538_v7 }
0x2245   :  { %v1597_v10 = vadd.f32 0.5, %v1596_v9 }
0x2247   :  { %v1601_v16 = vmul.f32 %v1599_v14, %v1597_v10 }
0x22b5   :  { %v1604_v11 = vpop.permute.xlu0 %1603 }
0x22b6   :  { %v1606_v13 = vmul.f32 %v1604_v11, %v1597_v10 }
0x22b8   :  { %1608 = vrot.lane.b32.xlu1 %v1606_v13, %s2656_s26  ;;  %v1944_v13 = vld [vmem:[%s3077_s8 + $0x8] sm:$0xff] }
0x232a   :  { %v1609_v18 = vpop.permute.xlu1 %1608 }
0x232b   :  { %v1611_v19 = vadd.f32 %v1609_v18, %v1601_v16  ;;  %v1945_v16 = vld [vmem:[%s3077_s8 + $0x10] sm:$0xff] }
0x232d   :  { %2539 = vtanh.f32 %v1611_v19 }
0x2337   :  { %v2540_v20 = vpop.eup %2539 }
0x2338   :  { %1614 = vrot.lane.b32.xlu0 %v2540_v20, %s2656_s26 }
0x23aa   :  { %v1615_v21 = vpop.permute.xlu0 %1614 }
0x23ab   :  { %v1617_v22 = vmul.f32 %v1615_v21, %v1597_v10 }
0x23ad   :  { %1619 = vrot.lane.b32.xlu1 %v1617_v22, %s2657_s1 }
0x241f   :  { %v1620_v23 = vpop.permute.xlu1 %1619 }
0x2420   :  { %1622 = vst.msk [vmem:[#allocation2 + $0x8] sm:$0x3] %vm1196_vm4, %v1620_v23  ;;  %2331 = vmatmul.mubr.msk.f32.vlgmr.msra.gmra.mrb[16].mxu1 %vm281_vm3, %v1620_v23 }
0x2421   :  { %2466 = vmatpush3.bf16.msra.mxu1 %v2921_v50  ;;  %2352 = vmatprep.mubr.msk.f32.mxu1 %vm2654_vm0, %v2655_v1  ;;  %v1703_v1 = vrot.slane %v1611_v19, 6 }
0x2422   :  { %2467 = vmatprep.subr.bf16.mxu1 %v2653_v0 }
0x2425   :  { %2469 = vmatpush3.bf16.msra.mxu1 %v2927_v52 }
0x24f3   :  { %v1691_v24 = vpop.f32.mrb[16].mxu1 }
0x24f4   :  { %v1696_v25 = vrot.slane %v1691_v24, 6  ;;  %v2332_v26 = vpop.f32.mrb[17].mxu1 }
0x24f5   :  { %v2065_v26 = vld [vmem:[#allocation8] ss:$0 sm:$0xff] }
0x24f6   :  { %v1698_v27 = vadd.f32 %v1696_v25, %v2834_v40 }
0x24f8   :  { %2541 = vtanh.f32 %v1698_v27 }
0x2502   :  { %v2542_v29 = vpop.eup %2541 }
0x2503   :  { %1707 = vrot.lane.b32.xlu0 %v2542_v29, %s2656_s26  ;;  %v1700_v30 = vmul.f32 0.5, %v2542_v29 }
0x2505   :  { %v1701_v31 = vadd.f32 0.5, %v1700_v30 }
0x2507   :  { %v1705_v33 = vmul.f32 %v1703_v1, %v1701_v31 }
0x2575   :  { %v1708_v32 = vpop.permute.xlu0 %1707 }
0x2576   :  { %v1710_v50 = vmul.f32 %v1708_v32, %v1701_v31 }
0x2578   :  { %1712 = vrot.lane.b32.xlu1 %v1710_v50, %s2656_s26 }
0x25ea   :  { %v1713_v0 = vpop.permute.xlu1 %1712 }
0x25eb   :  { %v1715_v34 = vadd.f32 %v1713_v0, %v1705_v33 }
0x25ed   :  { %2543 = vtanh.f32 %v1715_v34  ;;  %v1810_v51 = vrot.slane %v1715_v34, 6 }
0x25f7   :  { %v2544_v52 = vpop.eup %2543 }
0x25f8   :  { %1718 = vrot.lane.b32.xlu0 %v2544_v52, %s2656_s26 }
0x266a   :  { %v1719_v35 = vpop.permute.xlu0 %1718 }
0x266b   :  { %v1721_v17 = vmul.f32 %v1719_v35, %v1701_v31 }
0x266d   :  { %v1727_v36 = vrot.slane %v1721_v17, 2 }
0x266f   :  { %1728 = vrot.lane.b32.xlu1 %v1727_v36, %s2657_s1 }
0x26e1   :  { %v1729_v37 = vpop.permute.xlu1 %1728 }
0x26e2   :  { %2342 = vmatmul.mubr.msk.f32.vlgmr.msra.gmra.mrb[14].mxu0 %vm281_vm3, %v1729_v37 }
0x27b5   :  { %v1798_v39 = vpop.f32.mrb[14].mxu0 }
0x27b6   :  { %v1803_v42 = vrot.slane %v1798_v39, 4  ;;  %v2343_v43 = vpop.f32.mrb[15].mxu0 }
0x27b8   :  { %v1805_v44 = vadd.f32 %v1803_v42, %v2834_v40 }
0x27ba   :  { %2545 = vtanh.f32 %v1805_v44 }
0x27c4   :  { %v2546_v45 = vpop.eup %2545 }
0x27c5   :  { %1814 = vrot.lane.b32.xlu0 %v2546_v45, %s2656_s26  ;;  %v1807_v46 = vmul.f32 0.5, %v2546_v45 }
0x27c7   :  { %v1808_v47 = vadd.f32 0.5, %v1807_v46 }
0x27c9   :  { %v1812_v53 = vmul.f32 %v1810_v51, %v1808_v47 }
0x2837   :  { %v1815_v15 = vpop.permute.xlu0 %1814 }
0x2838   :  { %v1817_v49 = vmul.f32 %v1815_v15, %v1808_v47 }
0x283a   :  { %1819 = vrot.lane.b32.xlu1 %v1817_v49, %s2656_s26 }
0x28ac   :  { %v1820_v54 = vpop.permute.xlu1 %1819 }
0x28ad   :  { %v1822_v55 = vadd.f32 %v1820_v54, %v1812_v53 }
0x28af   :  { %2547 = vtanh.f32 %v1822_v55  ;;  %v1917_v38 = vrot.slane %v1822_v55, 6 }
0x28b9   :  { %v2548_v56 = vpop.eup %2547 }
0x28ba   :  { %1825 = vrot.lane.b32.xlu0 %v2548_v56, %s2656_s26 }
0x292c   :  { %v1826_v57 = vpop.permute.xlu0 %1825 }
0x292d   :  { %v1828_v59 = vmul.f32 %v1826_v57, %v1808_v47 }
0x292f   :  { %v1834_v60 = vrot.slane %v1828_v59, 4 }
0x2931   :  { %1835 = vrot.lane.b32.xlu1 %v1834_v60, %s2657_s1 }
0x29a3   :  { %v1836_v61 = vpop.permute.xlu1 %1835 }
0x29a4   :  { %2353 = vmatmul.mubr.msk.f32.vlgmr.msra.gmra.mrb[18].mxu1 %vm281_vm3, %v1836_v61 }
0x2a77   :  { %v1905_v62 = vpop.f32.mrb[18].mxu1 }
0x2a78   :  { %v1910_v8 = vrot.slane %v1905_v62, 2  ;;  %v2354_v63 = vpop.f32.mrb[19].mxu1 }
0x2a7a   :  { %v1912_v2 = vadd.f32 %v1910_v8, %v2834_v40 }
0x2a7c   :  { %2549 = vtanh.f32 %v1912_v2 }
0x2a86   :  { %v2550_v3 = vpop.eup %2549 }
0x2a87   :  { %1921 = vrot.lane.b32.xlu0 %v2550_v3, %s2656_s26  ;;  %v1914_v4 = vmul.f32 0.5, %v2550_v3 }
0x2a89   :  { %v1915_v12 = vadd.f32 0.5, %v1914_v4 }
0x2a8b   :  { %v1919_v40 = vmul.f32 %v1917_v38, %v1915_v12 }
0x2af9   :  { %v1922_v5 = vpop.permute.xlu0 %1921 }
0x2afa   :  { %v1924_v6 = vmul.f32 %v1922_v5, %v1915_v12 }
0x2afc   :  { %1926 = vrot.lane.b32.xlu1 %v1924_v6, %s2656_s26 }
0x2b00   :  { %1298 = vrot.lane.b32.xlu1 %v2966_v28, %s2657_s1 }
0x2b04   :  { %1514 = vrot.lane.b32.xlu1 %v2996_v58, %s2657_s1  ;;  %v1943_v58 = vld [vmem:[%s3077_s8] sm:$0xff] }
0x2b05   :  { %v2470_v14 = vpack.c.bf16 %v1944_v13, %v1943_v58 }
0x2b07   :  { %2471 = vmatprep.subr.bf16.mxu0 %v2470_v14 }
0x2b08   :  { %1830 = vrot.lane.b32.xlu1 %v1828_v59, %s2657_s1  ;;  %2473 = vmatpush3.bf16.msra.mxu0 %v2470_v14 }
0x2b6e   :  { %v1927_v41 = vpop.permute.xlu1 %1926 }
0x2b6f   :  { %v1929_v7 = vadd.f32 %v1927_v41, %v1919_v40 }
0x2b71   :  { %2551 = vtanh.f32 %v1929_v7 }
0x2b72   :  { %v1299_v9 = vpop.permute.xlu1 %1298 }
0x2b73   :  { %1302 = vst.msk [vmem:[#allocation2] sm:$0xc] %vm1301_vm5, %v1299_v9 }
0x2b76   :  { %v1515_v10 = vpop.permute.xlu1 %1514 }
0x2b77   :  { %1518 = vst.msk [vmem:[#allocation2] sm:$0xc0] %vm1517_vm6, %v1515_v10 }
0x2b7a   :  { %v1831_v28 = vpop.permute.xlu1 %1830 }
0x2b7b   :  { %v2552_v11 = vpop.eup %2551  ;;  %1833 = vst.msk [vmem:[#allocation2 + $0x8] sm:$0x30] %vm1409_vm7, %v1831_v28 }
0x2b7c   :  { %1932 = vrot.lane.b32.xlu0 %v2552_v11, %s2656_s26 }
0x2b80   :  { %1406 = vrot.lane.b32.xlu0 %v2981_v48, %s2657_s1  ;;  %v1946_v48 = vld [vmem:[%s3077_s8 + $0x18] sm:$0xff] }
0x2b81   :  { %v2474_v18 = vpack.c.bf16 %v1946_v48, %v1945_v16 }
0x2b83   :  { %2475 = vmatprep.subr.bf16.mxu0 %v2474_v18 }
0x2b84   :  { %1723 = vrot.lane.b32.xlu0 %v1721_v17, %s2657_s1  ;;  %2477 = vmatpush3.bf16.msra.mxu0 %v2474_v18 }
0x2bee   :  { %v1933_v19 = vpop.permute.xlu0 %1932 }
0x2bef   :  { %v1935_v20 = vmul.f32 %v1933_v19, %v1915_v12 }
0x2bf1   :  { %1937 = vrot.lane.b32.xlu0 %v1935_v20, %s2657_s1 }
0x2bf2   :  { %v1407_v21 = vpop.permute.xlu0 %1406 }
0x2bf3   :  { %1410 = vst.msk [vmem:[#allocation2] sm:$0x30] %vm1409_vm7, %v1407_v21 }
0x2bf6   :  { %v1724_v22 = vpop.permute.xlu0 %1723 }
0x2bf7   :  { %1726 = vst.msk [vmem:[#allocation2 + $0x8] sm:$0xc] %vm1301_vm5, %v1724_v22 }
0x2bfa   :  { %v1941_v23 = vld [vmem:[#allocation2] sm:$0xff] }
0x2bfb   :  { %2363 = vmatprep.mubr.msk.f32.mxu0 %vm281_vm3, %v1941_v23 }
0x2c63   :  { %v1938_v24 = vpop.permute.xlu0 %1937 }
0x2c64   :  { %1940 = vst.msk [vmem:[#allocation2 + $0x8] sm:$0xc0] %vm1517_vm6, %v1938_v24 }
0x2c6b   :  { %v1942_v25 = vld [vmem:[#allocation2 + $0x8] sm:$0xff] }
0x2c6c   :  { %2364 = vmatmul.mubr.msk.f32.vlgmr.msra.gmra.mrb[16].mxu0 %vm281_vm3, %v1942_v25 }
0x2d3f   :  { %v2365_v27 = vpop.f32.mrb[16].mxu0 }
0x2d40   :  { %v2032_v29 = vadd.f32 %v2365_v27, %v2065_v26  ;;  %v2026_v30 = vpop.f32.mrb[17].mxu0 }
0x2d41   :  { %v2027_v31 = vadd.f32 %v2065_v26, %v2026_v30 }
0x2d42   :  { %2036 = vst [vmem:[%s3079_s10 + $0x8] sm:$0xff] %v2032_v29 }
0x2d43   :  { %2035 = vst [vmem:[%s3079_s10] sm:$0xff] %v2027_v31 }
0x2d44   :  { %2041 = vsyncpa [#allocation4], 1 }
0x2d45   :  { %2042 = vsyncpa [#allocation6], 1 }
0x2d46   :  { %2043 = vsyncpa [#allocation9], 1 }

</bundles_post_ra>
